<compile_context>
chip_gen: v7x
topology: tpu7x:2x2x1
jax: 0.10.0
libtpu: 0.0.40
codegen_flags: <defaults>
</compile_context>

<pallas_src>
import jax
import jax.numpy as jnp
import numpy as np
from jax.experimental import pallas as pl
from jax.experimental.pallas import tpu as pltpu

# ---- module constants (from the PyTorch file) -------------------------------
N_EMBD = 128
N_HEAD = 8
HEAD_SIZE = N_EMBD // N_HEAD  # 16
LN_EPS = 1e-5


def _layernorm(x, gamma, beta):
    mean = jnp.mean(x, axis=-1, keepdims=True)
    var = jnp.mean((x - mean) ** 2, axis=-1, keepdims=True)
    return (x - mean) * jax.lax.rsqrt(var + LN_EPS) * gamma + beta


def block_kernel(
    x_ref,        # (Bb, T, C)  f32
    ln1_g_ref,    # (1, C)      f32
    ln1_b_ref,    # (1, C)      f32
    wqkv_ref,     # (C, 3C)     bf16  [Wq*C**-0.5 | Wk | Wv], columns grouped per head
    wp_ref,       # (C, C)      bf16  output projection
    bp_ref,       # (1, C)      f32
    ln2_g_ref,    # (1, C)      f32
    ln2_b_ref,    # (1, C)      f32
    w1_ref,       # (C, 4C)     bf16
    b1_ref,       # (1, 4C)     f32
    w2_ref,       # (4C, C)     bf16
    b2_ref,       # (1, C)      f32
    o_ref,        # (Bb, T, C)
):
    Bb, T, C = x_ref.shape
    H, hs = N_HEAD, HEAD_SIZE
    R = Bb * T

    # Flatten batch*time into rows: every dense matmul sees a tall (R, *) M dim.
    x = x_ref[...].astype(jnp.float32).reshape(R, C)

    # ---------------- self-attention branch ----------------
    xn1 = _layernorm(x, ln1_g_ref[0], ln1_b_ref[0])                       # (R, C) f32

    qkv = jnp.dot(xn1.astype(jnp.bfloat16), wqkv_ref[...],
                  preferred_element_type=jnp.float32)                     # (R, 3C) f32

    def to_heads(t):
        # (R, C) -> (Bb*H, T, hs). Head h = column block [h*hs, (h+1)*hs), which
        # matches the fused wqkv column grouping and the wp row order.
        return (t.reshape(Bb, T, H, hs)
                 .transpose(0, 2, 1, 3)
                 .reshape(Bb * H, T, hs)
                 .astype(jnp.bfloat16))

    qh = to_heads(qkv[:, :C])          # scale already folded into Wq host-side
    kh = to_heads(qkv[:, C:2 * C])
    vh = to_heads(qkv[:, 2 * C:])

    # Additive causal bias: 0 on/below diagonal, -1e30 above (finite => NaN-robust).
    row = jax.lax.broadcasted_iota(jnp.int32, (T, T), 0)
    col = jax.lax.broadcasted_iota(jnp.int32, (T, T), 1)
    bias = jnp.where(row >= col, jnp.float32(0.0), jnp.float32(-1e30))[None]  # (1,T,T)

    # One batched attention over Bb*H heads (leading-batch einsum form).
    s = jnp.einsum("bqd,bkd->bqk", qh, kh,
                   preferred_element_type=jnp.float32) + bias              # (Bb*H, T, T)
    s = s - jnp.max(s, axis=-1, keepdims=True)
    p = jnp.exp(s)
    denom = jnp.sum(p, axis=-1, keepdims=True)                             # (Bb*H, T, 1)
    oh = jnp.einsum("bqk,bkd->bqd", p.astype(jnp.bfloat16), vh,
                    preferred_element_type=jnp.float32)                    # (Bb*H, T, hs)
    oh = oh * pl.reciprocal(denom, approx=True)          # deferred softmax normalization

    attn = (oh.reshape(Bb, H, T, hs)
              .transpose(0, 2, 1, 3)
              .reshape(R, C))                                              # (R, C) f32
    sa = jnp.dot(attn.astype(jnp.bfloat16), wp_ref[...],
                 preferred_element_type=jnp.float32) + bp_ref[0]
    x1 = x + sa                                                            # residual 1

    # ---------------- feed-forward branch -------------------
    xn2 = _layernorm(x1, ln2_g_ref[0], ln2_b_ref[0])
    hdn = jnp.dot(xn2.astype(jnp.bfloat16), w1_ref[...],
                  preferred_element_type=jnp.float32) + b1_ref[0]
    hdn = jnp.maximum(hdn, 0.0)                           # ReLU; (R, 4C) lane-dense
    ff = jnp.dot(hdn.astype(jnp.bfloat16), w2_ref[...],
                 preferred_element_type=jnp.float32) + b2_ref[0]

    o_ref[...] = (x1 + ff).reshape(Bb, T, C).astype(o_ref.dtype)           # residual 2


def _pick_batch_block(B, T, rows_target=1024):
    """Pick Bb so Bb*T ~= rows_target rows/step; keep >= 2 grid steps when possible."""
    bb = max(1, min(B, max(1, rows_target // max(T, 1))))
    while B % bb:
        bb -= 1
    # Prefer >= 2 grid steps so a v7x megacore can shard the 'parallel' axis.
    # Relaxed floor: any split that yields >= 2 steps beats leaving one TC idle.
    if B // bb < 2 and bb > 1:
        half = bb // 2
        while half > 1 and B % half:
            half -= 1
        if half >= 1 and B // half >= 2:
            bb = half
    return bb


def block_forward(x, params):
    B, T, C = x.shape
    assert C == N_EMBD
    Bb = _pick_batch_block(B, T)

    # Fuse QKV weights host-side; fold the reference's C**-0.5 score scale into the
    # Wq third (in f32, before the bf16 cast). Matmul weights fed as bf16.
    scale = np.float32(N_EMBD) ** np.float32(-0.5)
    wqkv = jnp.concatenate(
        [params["wq"] * scale, params["wk"], params["wv"]], axis=1).astype(jnp.bfloat16)
    wp = params["wp"].astype(jnp.bfloat16)
    w1 = params["w1"].astype(jnp.bfloat16)
    w2 = params["w2"].astype(jnp.bfloat16)

    # Constant index_map => weights are fetched once and revisited across grid steps.
    full = lambda shape: pl.BlockSpec(shape, lambda i: (0,) * len(shape))

    in_specs = [
        pl.BlockSpec((Bb, T, C), lambda i: (i, 0, 0)),  # x
        full((1, C)), full((1, C)),                     # ln1 gamma / beta
        full((C, 3 * C)),                               # fused Wqkv (bf16, Wq pre-scaled)
        full((C, C)), full((1, C)),                     # proj W (bf16), b
        full((1, C)), full((1, C)),                     # ln2 gamma / beta
        full((C, 4 * C)), full((1, 4 * C)),             # ffn W1 (bf16), b1
        full((4 * C, C)), full((1, C)),                 # ffn W2 (bf16), b2
    ]

    return pl.pallas_call(
        block_kernel,
        out_shape=jax.ShapeDtypeStruct((B, T, C), x.dtype),
        grid_spec=pltpu.PrefetchScalarGridSpec(
            num_scalar_prefetch=0,
            grid=(B // Bb,),
            in_specs=in_specs,
            out_specs=pl.BlockSpec((Bb, T, C), lambda i: (i, 0, 0)),
        ),
        compiler_params=pltpu.CompilerParams(
            dimension_semantics=("parallel",),
            vmem_limit_bytes=48 * 1024 * 1024,   # above 16/32 MiB scoped defaults, under v7x's 64 MiB
        ),
    )(
        x,
        params["ln1_g"], params["ln1_b"],
        wqkv,
        wp, params["bp"],
        params["ln2_g"], params["ln2_b"],
        w1, params["b1"],
        w2, params["b2"],
    )


# ------------------------- pure-JAX f32 reference ----------------------------
def block_reference(x, p):
    def ln(z, g, b):
        m = jnp.mean(z, axis=-1, keepdims=True)
        v = jnp.mean((z - m) ** 2, axis=-1, keepdims=True)
        return (z - m) * jax.lax.rsqrt(v + LN_EPS) * g + b

    B, T, C = x.shape
    xn1 = ln(x, p["ln1_g"][0], p["ln1_b"][0])
    q = xn1 @ p["wq"]
    k = xn1 @ p["wk"]
    v = xn1 @ p["wv"]
    mask = jnp.tril(jnp.ones((T, T), bool))
    outs = []
    for h in range(N_HEAD):
        sl = slice(h * HEAD_SIZE, (h + 1) * HEAD_SIZE)
        s = (q[:, :, sl] @ jnp.swapaxes(k[:, :, sl], -1, -2)) * (C ** -0.5)
        s = jnp.where(mask, s, -jnp.inf)
        w = jax.nn.softmax(s, axis=-1)
        outs.append(w @ v[:, :, sl])
    attn = jnp.concatenate(outs, axis=-1)
    x1 = x + attn @ p["wp"] + p["bp"][0]
    xn2 = ln(x1, p["ln2_g"][0], p["ln2_b"][0])
    ff = jnp.maximum(xn2 @ p["w1"] + p["b1"][0], 0.0) @ p["w2"] + p["b2"][0]
    return x1 + ff


def init_params(key):
    ks = jax.random.split(key, 8)
    s = 0.02
    C = N_EMBD
    return {
        "ln1_g": jnp.ones((1, C), jnp.float32),
        "ln1_b": jnp.zeros((1, C), jnp.float32),
        "wq": jax.random.normal(ks[0], (C, C), jnp.float32) * s,
        "wk": jax.random.normal(ks[1], (C, C), jnp.float32) * s,
        "wv": jax.random.normal(ks[2], (C, C), jnp.float32) * s,
        "wp": jax.random.normal(ks[3], (C, C), jnp.float32) * s,
        "bp": jnp.zeros((1, C), jnp.float32),
        "ln2_g": jnp.ones((1, C), jnp.float32),
        "ln2_b": jnp.zeros((1, C), jnp.float32),
        "w1": jax.random.normal(ks[4], (C, 4 * C), jnp.float32) * s,
        "b1": jnp.zeros((1, 4 * C), jnp.float32),
        "w2": jax.random.normal(ks[5], (4 * C, C), jnp.float32) * s,
        "b2": jnp.zeros((1, C), jnp.float32),
    }


if __name__ == "__main__":
    key = jax.random.PRNGKey(0)
    k_param, k_x = jax.random.split(key)

    B, T = 2, 16  # T <= block_size (128)
    params = init_params(k_param)
    x = jax.random.normal(k_x, (B, T, N_EMBD), jnp.float32)

    out = jax.block_until_ready(block_forward(x, params))
    ref = jax.block_until_ready(block_reference(x, params))

    # bf16 matmul weights / activations + approx reciprocal in the kernel => compare
    # against the f32 reference with a correspondingly looser tolerance.
    np.testing.assert_allclose(np.asarray(out), np.asarray(ref), rtol=2e-2, atol=2e-2)
    print("KERNEL_OK")
</pallas_src>

<mosaic_0001>
module attributes {stable_mosaic.version = 11 : i64} {
  func.func @block_kernel(%arg0: i32, %arg1: memref<1x16x128xf32, #tpu.memory_space<vmem>>, %arg2: memref<1x128xf32, #tpu.memory_space<vmem>>, %arg3: memref<1x128xf32, #tpu.memory_space<vmem>>, %arg4: memref<128x384xbf16, #tpu.memory_space<vmem>>, %arg5: memref<128x128xbf16, #tpu.memory_space<vmem>>, %arg6: memref<1x128xf32, #tpu.memory_space<vmem>>, %arg7: memref<1x128xf32, #tpu.memory_space<vmem>>, %arg8: memref<1x128xf32, #tpu.memory_space<vmem>>, %arg9: memref<128x512xbf16, #tpu.memory_space<vmem>>, %arg10: memref<1x512xf32, #tpu.memory_space<vmem>>, %arg11: memref<512x128xbf16, #tpu.memory_space<vmem>>, %arg12: memref<1x128xf32, #tpu.memory_space<vmem>>, %arg13: memref<1x16x128xf32, #tpu.memory_space<vmem>>) attributes {dimension_semantics = [#tpu.dimension_semantics<parallel>], iteration_bounds = array<i64: 2>, scalar_prefetch = 0 : i64, scratch_operands = 0 : i64, tpu.core_type = #tpu.core_type<tc>, window_params = [{transform_indices = @transform_0, window_bounds = array<i64: 1, 16, 128>}, {pipeline_mode = #tpu.pipeline_mode<synchronous>, transform_indices = @transform_1, window_bounds = array<i64: 1, 128>}, {pipeline_mode = #tpu.pipeline_mode<synchronous>, transform_indices = @transform_2, window_bounds = array<i64: 1, 128>}, {pipeline_mode = #tpu.pipeline_mode<synchronous>, transform_indices = @transform_3, window_bounds = array<i64: 128, 384>}, {pipeline_mode = #tpu.pipeline_mode<synchronous>, transform_indices = @transform_4, window_bounds = array<i64: 128, 128>}, {pipeline_mode = #tpu.pipeline_mode<synchronous>, transform_indices = @transform_5, window_bounds = array<i64: 1, 128>}, {pipeline_mode = #tpu.pipeline_mode<synchronous>, transform_indices = @transform_6, window_bounds = array<i64: 1, 128>}, {pipeline_mode = #tpu.pipeline_mode<synchronous>, transform_indices = @transform_7, window_bounds = array<i64: 1, 128>}, {pipeline_mode = #tpu.pipeline_mode<synchronous>, transform_indices = @transform_8, window_bounds = array<i64: 128, 512>}, {pipeline_mode = #tpu.pipeline_mode<synchronous>, transform_indices = @transform_9, window_bounds = array<i64: 1, 512>}, {pipeline_mode = #tpu.pipeline_mode<synchronous>, transform_indices = @transform_10, window_bounds = array<i64: 512, 128>}, {pipeline_mode = #tpu.pipeline_mode<synchronous>, transform_indices = @transform_11, window_bounds = array<i64: 1, 128>}, {transform_indices = @transform_12, window_bounds = array<i64: 1, 16, 128>}]} {
    %c0 = arith.constant 0 : index
    %c0_0 = arith.constant 0 : index
    %c0_1 = arith.constant 0 : index
    %0 = vector.load %arg1[%c0, %c0_0, %c0_1] : memref<1x16x128xf32, #tpu.memory_space<vmem>>, vector<1x16x128xf32>
    %1 = vector.shape_cast %0 : vector<1x16x128xf32> to vector<16x128xf32>
    %c0_2 = arith.constant 0 : index
    %c0_3 = arith.constant 0 : index
    %2 = vector.load %arg2[%c0_2, %c0_3] : memref<1x128xf32, #tpu.memory_space<vmem>>, vector<1x128xf32>
    %3 = vector.shape_cast %2 : vector<1x128xf32> to vector<128xf32>
    %c0_4 = arith.constant 0 : index
    %c0_5 = arith.constant 0 : index
    %4 = vector.load %arg3[%c0_4, %c0_5] : memref<1x128xf32, #tpu.memory_space<vmem>>, vector<1x128xf32>
    %5 = vector.shape_cast %4 : vector<1x128xf32> to vector<128xf32>
    %cst = arith.constant dense<0.000000e+00> : vector<16xf32>
    %6 = vector.multi_reduction <add>, %1, %cst [1] : vector<16x128xf32> to vector<16xf32>
    %7 = vector.shape_cast %6 : vector<16xf32> to vector<16x1xf32>
    %cst_6 = arith.constant 1.280000e+02 : f32
    %8 = vector.broadcast %cst_6 : f32 to vector<16x1xf32>
    %9 = arith.divf %7, %8 : vector<16x1xf32>
    %10 = vector.broadcast %9 : vector<16x1xf32> to vector<16x128xf32>
    %11 = arith.subf %1, %10 : vector<16x128xf32>
    %12 = arith.mulf %11, %11 : vector<16x128xf32>
    %cst_7 = arith.constant dense<0.000000e+00> : vector<16xf32>
    %13 = vector.multi_reduction <add>, %12, %cst_7 [1] : vector<16x128xf32> to vector<16xf32>
    %14 = vector.shape_cast %13 : vector<16xf32> to vector<16x1xf32>
    %cst_8 = arith.constant 1.280000e+02 : f32
    %15 = vector.broadcast %cst_8 : f32 to vector<16x1xf32>
    %16 = arith.divf %14, %15 : vector<16x1xf32>
    %17 = vector.broadcast %9 : vector<16x1xf32> to vector<16x128xf32>
    %18 = arith.subf %1, %17 : vector<16x128xf32>
    %cst_9 = arith.constant 9.99999974E-6 : f32
    %19 = vector.broadcast %cst_9 : f32 to vector<16x1xf32>
    %20 = arith.addf %16, %19 : vector<16x1xf32>
    %21 = math.rsqrt %20 : vector<16x1xf32>
    %22 = vector.broadcast %21 : vector<16x1xf32> to vector<16x128xf32>
    %23 = arith.mulf %18, %22 : vector<16x128xf32>
    %24 = vector.shape_cast %3 : vector<128xf32> to vector<1x128xf32>
    %25 = vector.broadcast %24 : vector<1x128xf32> to vector<16x128xf32>
    %26 = arith.mulf %23, %25 : vector<16x128xf32>
    %27 = vector.shape_cast %5 : vector<128xf32> to vector<1x128xf32>
    %28 = vector.broadcast %27 : vector<1x128xf32> to vector<16x128xf32>
    %29 = arith.addf %26, %28 : vector<16x128xf32>
    %30 = arith.truncf %29 : vector<16x128xf32> to vector<16x128xbf16>
    %c0_10 = arith.constant 0 : index
    %c0_11 = arith.constant 0 : index
    %31 = vector.load %arg4[%c0_10, %c0_11] : memref<128x384xbf16, #tpu.memory_space<vmem>>, vector<128x384xbf16>
    %cst_12 = arith.constant dense<0.000000e+00> : vector<16x384xf32>
    %32 = tpu.matmul %30, %31, %cst_12 {dimension_numbers = #tpu.dot_dimension_numbers<[1], [0], [0], [1], [0, 0, 1, 1], [], []>} : vector<16x128xbf16>, vector<128x384xbf16>, vector<16x384xf32> -> vector<16x384xf32>
    %33 = vector.extract_strided_slice %32 {offsets = [0, 0], sizes = [16, 128], strides = [1, 1]} : vector<16x384xf32> to vector<16x128xf32>
    %34 = vector.shape_cast %33 : vector<16x128xf32> to vector<1x16x8x16xf32>
    %35 = tpu.transpose %34, [0, 2, 1, 3] : vector<1x16x8x16xf32> -> vector<1x8x16x16xf32>
    %36 = vector.shape_cast %35 : vector<1x8x16x16xf32> to vector<8x16x16xf32>
    %37 = arith.truncf %36 : vector<8x16x16xf32> to vector<8x16x16xbf16>
    %38 = vector.extract_strided_slice %32 {offsets = [0, 128], sizes = [16, 128], strides = [1, 1]} : vector<16x384xf32> to vector<16x128xf32>
    %39 = vector.shape_cast %38 : vector<16x128xf32> to vector<1x16x8x16xf32>
    %40 = tpu.transpose %39, [0, 2, 1, 3] : vector<1x16x8x16xf32> -> vector<1x8x16x16xf32>
    %41 = vector.shape_cast %40 : vector<1x8x16x16xf32> to vector<8x16x16xf32>
    %42 = arith.truncf %41 : vector<8x16x16xf32> to vector<8x16x16xbf16>
    %43 = vector.extract_strided_slice %32 {offsets = [0, 256], sizes = [16, 128], strides = [1, 1]} : vector<16x384xf32> to vector<16x128xf32>
    %44 = vector.shape_cast %43 : vector<16x128xf32> to vector<1x16x8x16xf32>
    %45 = tpu.transpose %44, [0, 2, 1, 3] : vector<1x16x8x16xf32> -> vector<1x8x16x16xf32>
    %46 = vector.shape_cast %45 : vector<1x8x16x16xf32> to vector<8x16x16xf32>
    %47 = arith.truncf %46 : vector<8x16x16xf32> to vector<8x16x16xbf16>
    %48 = tpu.iota {dimensions = array<i32: 0>} : vector<16x16xi32>
    %49 = tpu.iota {dimensions = array<i32: 1>} : vector<16x16xi32>
    %50 = arith.cmpi sge, %48, %49 : vector<16x16xi32>
    %cst_13 = arith.constant 0.000000e+00 : f32
    %cst_14 = arith.constant -1.000000e+30 : f32
    %51 = vector.broadcast %cst_13 : f32 to vector<16x16xf32>
    %52 = vector.broadcast %cst_14 : f32 to vector<16x16xf32>
    %53 = arith.select %50, %51, %52 : vector<16x16xi1>, vector<16x16xf32>
    %54 = vector.shape_cast %53 : vector<16x16xf32> to vector<1x16x16xf32>
    "tpu.trace_start"() <{level = 10 : i32, message = "bqd,bkd->bqk"}> : () -> ()
    %cst_15 = arith.constant dense<0.000000e+00> : vector<8x16x16xf32>
    %55 = tpu.matmul %37, %42, %cst_15 {dimension_numbers = #tpu.dot_dimension_numbers<[2], [2], [1], [1], [0, 0, 0, 1, 1, 1], [0], [0]>} : vector<8x16x16xbf16>, vector<8x16x16xbf16>, vector<8x16x16xf32> -> vector<8x16x16xf32>
    "tpu.trace_stop"() : () -> ()
    %56 = vector.broadcast %54 : vector<1x16x16xf32> to vector<8x16x16xf32>
    %57 = arith.addf %55, %56 : vector<8x16x16xf32>
    %cst_16 = arith.constant dense<0xFF800000> : vector<8x16xf32>
    %58 = vector.multi_reduction <maximumf>, %57, %cst_16 [2] : vector<8x16x16xf32> to vector<8x16xf32>
    %59 = vector.shape_cast %58 : vector<8x16xf32> to vector<8x16x1xf32>
    %60 = vector.broadcast %59 : vector<8x16x1xf32> to vector<8x16x16xf32>
    %61 = arith.subf %57, %60 : vector<8x16x16xf32>
    %62 = math.exp %61 : vector<8x16x16xf32>
    %cst_17 = arith.constant dense<0.000000e+00> : vector<8x16xf32>
    %63 = vector.multi_reduction <add>, %62, %cst_17 [2] : vector<8x16x16xf32> to vector<8x16xf32>
    %64 = vector.shape_cast %63 : vector<8x16xf32> to vector<8x16x1xf32>
    %65 = arith.truncf %62 : vector<8x16x16xf32> to vector<8x16x16xbf16>
    "tpu.trace_start"() <{level = 10 : i32, message = "bqk,bkd->bqd"}> : () -> ()
    %cst_18 = arith.constant dense<0.000000e+00> : vector<8x16x16xf32>
    %66 = tpu.matmul %65, %47, %cst_18 {dimension_numbers = #tpu.dot_dimension_numbers<[2], [1], [1], [2], [0, 0, 0, 1, 1, 2], [0], [0]>} : vector<8x16x16xbf16>, vector<8x16x16xbf16>, vector<8x16x16xf32> -> vector<8x16x16xf32>
    "tpu.trace_stop"() : () -> ()
    %67 = tpu.reciprocal %64 {approx = true} : vector<8x16x1xf32> -> vector<8x16x1xf32>
    %68 = vector.broadcast %67 : vector<8x16x1xf32> to vector<8x16x16xf32>
    %69 = arith.mulf %66, %68 : vector<8x16x16xf32>
    %70 = vector.shape_cast %69 : vector<8x16x16xf32> to vector<1x8x16x16xf32>
    %71 = tpu.transpose %70, [0, 2, 1, 3] : vector<1x8x16x16xf32> -> vector<1x16x8x16xf32>
    %72 = vector.shape_cast %71 : vector<1x16x8x16xf32> to vector<16x128xf32>
    %73 = arith.truncf %72 : vector<16x128xf32> to vector<16x128xbf16>
    %c0_19 = arith.constant 0 : index
    %c0_20 = arith.constant 0 : index
    %74 = vector.load %arg5[%c0_19, %c0_20] : memref<128x128xbf16, #tpu.memory_space<vmem>>, vector<128x128xbf16>
    %cst_21 = arith.constant dense<0.000000e+00> : vector<16x128xf32>
    %75 = tpu.matmul %73, %74, %cst_21 {dimension_numbers = #tpu.dot_dimension_numbers<[1], [0], [0], [1], [0, 0, 1, 1], [], []>} : vector<16x128xbf16>, vector<128x128xbf16>, vector<16x128xf32> -> vector<16x128xf32>
    %c0_22 = arith.constant 0 : index
    %c0_23 = arith.constant 0 : index
    %76 = vector.load %arg6[%c0_22, %c0_23] : memref<1x128xf32, #tpu.memory_space<vmem>>, vector<1x128xf32>
    %77 = vector.shape_cast %76 : vector<1x128xf32> to vector<128xf32>
    %78 = vector.shape_cast %77 : vector<128xf32> to vector<1x128xf32>
    %79 = vector.broadcast %78 : vector<1x128xf32> to vector<16x128xf32>
    %80 = arith.addf %75, %79 : vector<16x128xf32>
    %81 = arith.addf %1, %80 : vector<16x128xf32>
    %c0_24 = arith.constant 0 : index
    %c0_25 = arith.constant 0 : index
    %82 = vector.load %arg7[%c0_24, %c0_25] : memref<1x128xf32, #tpu.memory_space<vmem>>, vector<1x128xf32>
    %83 = vector.shape_cast %82 : vector<1x128xf32> to vector<128xf32>
    %c0_26 = arith.constant 0 : index
    %c0_27 = arith.constant 0 : index
    %84 = vector.load %arg8[%c0_26, %c0_27] : memref<1x128xf32, #tpu.memory_space<vmem>>, vector<1x128xf32>
    %85 = vector.shape_cast %84 : vector<1x128xf32> to vector<128xf32>
    %cst_28 = arith.constant dense<0.000000e+00> : vector<16xf32>
    %86 = vector.multi_reduction <add>, %81, %cst_28 [1] : vector<16x128xf32> to vector<16xf32>
    %87 = vector.shape_cast %86 : vector<16xf32> to vector<16x1xf32>
    %cst_29 = arith.constant 1.280000e+02 : f32
    %88 = vector.broadcast %cst_29 : f32 to vector<16x1xf32>
    %89 = arith.divf %87, %88 : vector<16x1xf32>
    %90 = vector.broadcast %89 : vector<16x1xf32> to vector<16x128xf32>
    %91 = arith.subf %81, %90 : vector<16x128xf32>
    %92 = arith.mulf %91, %91 : vector<16x128xf32>
    %cst_30 = arith.constant dense<0.000000e+00> : vector<16xf32>
    %93 = vector.multi_reduction <add>, %92, %cst_30 [1] : vector<16x128xf32> to vector<16xf32>
    %94 = vector.shape_cast %93 : vector<16xf32> to vector<16x1xf32>
    %cst_31 = arith.constant 1.280000e+02 : f32
    %95 = vector.broadcast %cst_31 : f32 to vector<16x1xf32>
    %96 = arith.divf %94, %95 : vector<16x1xf32>
    %97 = vector.broadcast %89 : vector<16x1xf32> to vector<16x128xf32>
    %98 = arith.subf %81, %97 : vector<16x128xf32>
    %cst_32 = arith.constant 9.99999974E-6 : f32
    %99 = vector.broadcast %cst_32 : f32 to vector<16x1xf32>
    %100 = arith.addf %96, %99 : vector<16x1xf32>
    %101 = math.rsqrt %100 : vector<16x1xf32>
    %102 = vector.broadcast %101 : vector<16x1xf32> to vector<16x128xf32>
    %103 = arith.mulf %98, %102 : vector<16x128xf32>
    %104 = vector.shape_cast %83 : vector<128xf32> to vector<1x128xf32>
    %105 = vector.broadcast %104 : vector<1x128xf32> to vector<16x128xf32>
    %106 = arith.mulf %103, %105 : vector<16x128xf32>
    %107 = vector.shape_cast %85 : vector<128xf32> to vector<1x128xf32>
    %108 = vector.broadcast %107 : vector<1x128xf32> to vector<16x128xf32>
    %109 = arith.addf %106, %108 : vector<16x128xf32>
    %110 = arith.truncf %109 : vector<16x128xf32> to vector<16x128xbf16>
    %c0_33 = arith.constant 0 : index
    %c0_34 = arith.constant 0 : index
    %111 = vector.load %arg9[%c0_33, %c0_34] : memref<128x512xbf16, #tpu.memory_space<vmem>>, vector<128x512xbf16>
    %cst_35 = arith.constant dense<0.000000e+00> : vector<16x512xf32>
    %112 = tpu.matmul %110, %111, %cst_35 {dimension_numbers = #tpu.dot_dimension_numbers<[1], [0], [0], [1], [0, 0, 1, 1], [], []>} : vector<16x128xbf16>, vector<128x512xbf16>, vector<16x512xf32> -> vector<16x512xf32>
    %c0_36 = arith.constant 0 : index
    %c0_37 = arith.constant 0 : index
    %113 = vector.load %arg10[%c0_36, %c0_37] : memref<1x512xf32, #tpu.memory_space<vmem>>, vector<1x512xf32>
    %114 = vector.shape_cast %113 : vector<1x512xf32> to vector<512xf32>
    %115 = vector.shape_cast %114 : vector<512xf32> to vector<1x512xf32>
    %116 = vector.broadcast %115 : vector<1x512xf32> to vector<16x512xf32>
    %117 = arith.addf %112, %116 : vector<16x512xf32>
    %cst_38 = arith.constant 0.000000e+00 : f32
    %118 = vector.broadcast %cst_38 : f32 to vector<16x512xf32>
    %119 = arith.maximumf %117, %118 : vector<16x512xf32>
    %120 = arith.truncf %119 : vector<16x512xf32> to vector<16x512xbf16>
    %c0_39 = arith.constant 0 : index
    %c0_40 = arith.constant 0 : index
    %121 = vector.load %arg11[%c0_39, %c0_40] : memref<512x128xbf16, #tpu.memory_space<vmem>>, vector<512x128xbf16>
    %cst_41 = arith.constant dense<0.000000e+00> : vector<16x128xf32>
    %122 = tpu.matmul %120, %121, %cst_41 {dimension_numbers = #tpu.dot_dimension_numbers<[1], [0], [0], [1], [0, 0, 1, 1], [], []>} : vector<16x512xbf16>, vector<512x128xbf16>, vector<16x128xf32> -> vector<16x128xf32>
    %c0_42 = arith.constant 0 : index
    %c0_43 = arith.constant 0 : index
    %123 = vector.load %arg12[%c0_42, %c0_43] : memref<1x128xf32, #tpu.memory_space<vmem>>, vector<1x128xf32>
    %124 = vector.shape_cast %123 : vector<1x128xf32> to vector<128xf32>
    %125 = vector.shape_cast %124 : vector<128xf32> to vector<1x128xf32>
    %126 = vector.broadcast %125 : vector<1x128xf32> to vector<16x128xf32>
    %127 = arith.addf %122, %126 : vector<16x128xf32>
    %128 = arith.addf %81, %127 : vector<16x128xf32>
    %129 = vector.shape_cast %128 : vector<16x128xf32> to vector<1x16x128xf32>
    %c0_44 = arith.constant 0 : index
    %c0_45 = arith.constant 0 : index
    %c0_46 = arith.constant 0 : index
    %130 = vector.load %arg13[%c0_44, %c0_45, %c0_46] : memref<1x16x128xf32, #tpu.memory_space<vmem>>, vector<1x16x128xf32>
    tpu.vector_store %arg13[%c0_44, %c0_45, %c0_46], %129 {strides = array<i32>} : memref<1x16x128xf32, #tpu.memory_space<vmem>>, vector<1x16x128xf32>,
    return
  }
  func.func @transform_0(%arg0: i32) -> (i32, i32, i32) {
    %c0_i32 = arith.constant 0 : i32
    %c0_i32_0 = arith.constant 0 : i32
    %c0_i32_1 = arith.constant 0 : i32
    return %arg0, %c0_i32, %c0_i32_0 : i32, i32, i32
  }
  func.func @transform_1(%arg0: i32) -> (i32, i32) {
    %c0_i32 = arith.constant 0 : i32
    %c0_i32_0 = arith.constant 0 : i32
    %c0_i32_1 = arith.constant 0 : i32
    return %c0_i32, %c0_i32_0 : i32, i32
  }
  func.func @transform_2(%arg0: i32) -> (i32, i32) {
    %c0_i32 = arith.constant 0 : i32
    %c0_i32_0 = arith.constant 0 : i32
    %c0_i32_1 = arith.constant 0 : i32
    return %c0_i32, %c0_i32_0 : i32, i32
  }
  func.func @transform_3(%arg0: i32) -> (i32, i32) {
    %c0_i32 = arith.constant 0 : i32
    %c0_i32_0 = arith.constant 0 : i32
    %c0_i32_1 = arith.constant 0 : i32
    return %c0_i32, %c0_i32_0 : i32, i32
  }
  func.func @transform_4(%arg0: i32) -> (i32, i32) {
    %c0_i32 = arith.constant 0 : i32
    %c0_i32_0 = arith.constant 0 : i32
    %c0_i32_1 = arith.constant 0 : i32
    return %c0_i32, %c0_i32_0 : i32, i32
  }
  func.func @transform_5(%arg0: i32) -> (i32, i32) {
    %c0_i32 = arith.constant 0 : i32
    %c0_i32_0 = arith.constant 0 : i32
    %c0_i32_1 = arith.constant 0 : i32
    return %c0_i32, %c0_i32_0 : i32, i32
  }
  func.func @transform_6(%arg0: i32) -> (i32, i32) {
    %c0_i32 = arith.constant 0 : i32
    %c0_i32_0 = arith.constant 0 : i32
    %c0_i32_1 = arith.constant 0 : i32
    return %c0_i32, %c0_i32_0 : i32, i32
  }
  func.func @transform_7(%arg0: i32) -> (i32, i32) {
    %c0_i32 = arith.constant 0 : i32
    %c0_i32_0 = arith.constant 0 : i32
    %c0_i32_1 = arith.constant 0 : i32
    return %c0_i32, %c0_i32_0 : i32, i32
  }
  func.func @transform_8(%arg0: i32) -> (i32, i32) {
    %c0_i32 = arith.constant 0 : i32
    %c0_i32_0 = arith.constant 0 : i32
    %c0_i32_1 = arith.constant 0 : i32
    return %c0_i32, %c0_i32_0 : i32, i32
  }
  func.func @transform_9(%arg0: i32) -> (i32, i32) {
    %c0_i32 = arith.constant 0 : i32
    %c0_i32_0 = arith.constant 0 : i32
    %c0_i32_1 = arith.constant 0 : i32
    return %c0_i32, %c0_i32_0 : i32, i32
  }
  func.func @transform_10(%arg0: i32) -> (i32, i32) {
    %c0_i32 = arith.constant 0 : i32
    %c0_i32_0 = arith.constant 0 : i32
    %c0_i32_1 = arith.constant 0 : i32
    return %c0_i32, %c0_i32_0 : i32, i32
  }
  func.func @transform_11(%arg0: i32) -> (i32, i32) {
    %c0_i32 = arith.constant 0 : i32
    %c0_i32_0 = arith.constant 0 : i32
    %c0_i32_1 = arith.constant 0 : i32
    return %c0_i32, %c0_i32_0 : i32, i32
  }
  func.func @transform_12(%arg0: i32) -> (i32, i32, i32) {
    %c0_i32 = arith.constant 0 : i32
    %c0_i32_0 = arith.constant 0 : i32
    %c0_i32_1 = arith.constant 0 : i32
    return %arg0, %c0_i32, %c0_i32_0 : i32, i32, i32
  }
}

</mosaic_0001>

<bundles_post_ra>
// kernel: tpu_custom_call.1
= control target key start
LH: loop header
LB: loop body
LE: loop exit
PB: predicated region body
PF: predicated region fallthrough
CT: control target
= control target key end

     0   :  { %s7452_s0 = inlined_call_operand.hbm [shape: f32[2,16,128], index: 0, kind: input, shape index: {}]   ;;  %s7453_s1 = inlined_call_operand.vmem [shape: f32[1,128], index: 1, kind: input, shape index: {}]   ;;  %s7454_s2 = inlined_call_operand.vmem [shape: f32[1,128], index: 2, kind: input, shape index: {}]   ;;  %s7455_s3 = inlined_call_operand.hbm [shape: bf16[128,384], index: 3, kind: input, shape index: {}]   ;;  %s7456_s4 = inlined_call_operand.hbm [shape: bf16[128,128], index: 4, kind: input, shape index: {}]   ;;  %s7457_s5 = inlined_call_operand.vmem [shape: f32[1,128], index: 5, kind: input, shape index: {}]   ;;  %s7458_s6 = inlined_call_operand.vmem [shape: f32[1,128], index: 6, kind: input, shape index: {}]   ;;  %s7459_s7 = inlined_call_operand.vmem [shape: f32[1,128], index: 7, kind: input, shape index: {}]   ;;  %s7460_s8 = inlined_call_operand.hbm [shape: bf16[128,512], index: 8, kind: input, shape index: {}]   ;;  %s7461_s9 = inlined_call_operand.vmem [shape: f32[1,512], index: 9, kind: input, shape index: {}]   ;;  %s7462_s10 = inlined_call_operand.hbm [shape: bf16[512,128], index: 10, kind: input, shape index: {}]   ;;  %s7463_s11 = inlined_call_operand.vmem [shape: f32[1,128], index: 11, kind: input, shape index: {}]   ;;  %s7464_s12 = inlined_call_operand.hbm [shape: f32[2,16,128], index: 12, kind: output, shape index: {}]  }
   0x1   :  { %7474 = sst [smem:[#allocation18_spill]] %s7455_s3 }
   0x2   :  { %7475 = sst [smem:[#allocation19_spill]] %s7461_s9 }
   0x3   :  { %7476 = sst [smem:[#allocation20_spill]] %s7463_s11 }
   0x4   :  { %7477 = sst [smem:[#allocation21_spill]] %s7464_s12 }
   0x5   :  { %17 = vsyncpa [#allocation3], 0 }
   0x6   :  { %19 = vsyncpa [#allocation3 + $0x1], 0 }
   0x7   :  { %20 = vsyncpa [#allocation6], 0 }
   0x8   :  { %21 = vsyncpa [#allocation9], 0 }
   0x9   :  { %22 = vsyncpa [#allocation4], 0 }
   0xa   :  { %24 = vsyncpa [#allocation4 + $0x1], 0  ;;  %s6138_s21 = smov 0   ;;  %s6140_s22 = smov 0  }
   0xb   :  { %s6142_s23 = smov 0   ;;  %s6144_s24 = smov 0  }
   0xc LB: > { %7478 = sst [smem:[#allocation16_spill]] %s6030_s21  ;;  %s6159_s25 = sadd.s32 4294967295, %s6042_s24   ;;  %s6042_s24 = sphi %s6144_s24, %s7508_s24   ;;  %s6038_s23 = sphi %s6142_s23, %s7507_s23   ;;  %s6034_s22 = sphi %s6140_s22, %s7506_s22   ;;  %s6030_s21 = sphi %s6138_s21, %s7505_s21  }
   0xd   : > { %s5051_s26 = sadd.s32 4294967294, %s6042_s24   ;;  %p50_p0 = scmp.ne.s32.totalorder %s6034_s22, %s6030_s21 }
   0xe   : > { %p7466_p1 = scmp.eq.s32.totalorder %s6159_s25, 0  ;;  %p311_p3 = scmp.eq.s32.totalorder %s5051_s26, 1 }
   0xf   : > { %p5052_p5 = scmp.ge.s32.totalorder %s6042_s24, 1  ;;  %p318_p7 = scmp.lt.s32.totalorder %s6042_s24, 3 }
  0x10   : > { %p6168_p4 = por %p7466_p1, %p50_p0  ;;  %p6173_p6 = por %p311_p3, %p50_p0 }
  0x11   : > { %p6178_p8 = pnand %p5052_p5, %p318_p7  ;;  %s6044_s30 = smov [#allocation5]  }
  0x12   : > { %s7479_s27 = scalar_select %p6168_p4, 1, 0 }
  0x13   : > { %s7480_s28 = scalar_select %p6173_p6, 1, 0 }
  0x14   : > { %s7482_s29 = scalar_select %p6178_p8, 1, 0 }
  0x15   : > { %7481 = sst [smem:[#allocation17_spill]] %s7480_s28  ;;  %s336_s13 = sshll.u32 %s6044_s30, 4  ;;  %s6182_s13 = int_to_ptr.vmem [resolvable:$true] %s336_s13 }
  0x16   : > { %p5507_p9 = pneg %p6178_p8  ;;  %s6045_s15 = smov [#allocation8]  }
  0x17   : > { %s371_s16 = sshll.u32 %s6045_s15, 4  ;;  %s7484_s3 = sld [smem:[#allocation18_spill]]  ;;  %s6193_s16 = int_to_ptr.vmem [resolvable:$true] %s371_s16 }
  0x18   : > { %p6189_p11 = pnand %p5507_p9, %p7466_p1 }
  0x1a   : > { %p6203_p13 = pneg %p6189_p11 }
  0x1d   : > { %s5826_s19 = scalar_lea.hbm %s7484_s3, 3072 }
  0x1e   : > { %p5827_p12 = scmp.ne.s32.totalorder %s7484_s3, %s5826_s19  ;;  %p5833_p5 = scmp.lt.u32.totalorder %s5826_s19, %s7484_s3 }
  0x20   : > { %p5829_p0 = pnand %p6203_p13, %p5827_p12 }
  0x22   : > { %p5830_p3 = pneg %p5829_p0 }
  0x24   : > { %p5835_p7 = pnand %p5833_p5, %p5830_p3 }
  0x26   : > { %5838 = shalt.err (!%p5835_p7)
}
  0x27   : > { %s5839_s17 = scalar_lea.vmem %s6182_s13, 3072  ;;  %p5847_p2 = scmp.lt.s32.totalorder %s6182_s13, %s6182_s13 }
  0x28   : > { %p5840_p9 = scmp.ne.s32.totalorder %s6182_s13, %s5839_s17  ;;  %p5848_p6 = scmp.lt.s32.totalorder %s5839_s17, %s5839_s17 }
  0x2a   : > { %p5842_p10 = pnand %p5840_p9, %p6203_p13  ;;  %p5849_p12 = por %p5848_p6, %p5847_p2 }
  0x2c   : > { %p5843_p1 = pneg %p5842_p10 }
  0x2e   : > { %p5850_p0 = pnand %p5849_p12, %p5843_p1 }
  0x30   : > { %5853 = shalt.err (!%p5850_p0)
}
  0x31   : > { %s6046_s18 = smov 192   ;;  %s6047_s28 = smov 12  }
  0x32   : > { %5510 = dma.hbm_to_vmem [thread:$0]  (!%p6189_p11), %s7484_s3, 3072, %s6182_s13, [#allocation6], %s6046_s18, %s6046_s18, %s6047_s28  }
  0x33   : > { %s5854_s21 = scalar_lea.hbm %s7460_s8, 4096 }
  0x34   : > { %p5855_p2 = scmp.ne.s32.totalorder %s7460_s8, %s5854_s21  ;;  %p5861_p10 = scmp.lt.u32.totalorder %s5854_s21, %s7460_s8 }
  0x36   : > { %p5857_p1 = pnand %p5855_p2, %p6203_p13 }
  0x38   : > { %p5858_p6 = pneg %p5857_p1 }
  0x3a   : > { %p5863_p3 = pnand %p5861_p10, %p5858_p6 }
  0x3c   : > { %5866 = shalt.err (!%p5863_p3)
}
  0x3d   : > { %s5867_s13 = scalar_lea.vmem %s6193_s16, 4096  ;;  %p5875_p12 = scmp.lt.s32.totalorder %s6193_s16, %s6193_s16 }
  0x3e   : > { %p5868_p5 = scmp.ne.s32.totalorder %s6193_s16, %s5867_s13  ;;  %p5876_p0 = scmp.lt.s32.totalorder %s5867_s13, %s5867_s13 }
  0x40   : > { %p5870_p7 = pnand %p5868_p5, %p6203_p13  ;;  %p5877_p2 = por %p5876_p0, %p5875_p12 }
  0x42   : > { %p5871_p9 = pneg %p5870_p7 }
  0x44   : > { %p5878_p1 = pnand %p5877_p2, %p5871_p9 }
  0x46   : > { %5881 = shalt.err (!%p5878_p1)
}
  0x47   : > { %s6048_s11 = smov 256   ;;  %s6049_s9 = smov 16  }
  0x48   : > { %5516 = dma.hbm_to_vmem [thread:$0]  (!%p6189_p11), %s7460_s8, 4096, %s6193_s16, [#allocation9], %s6048_s11, %s6048_s11, %s6049_s9  }
  0x49   : > { %s6050_s18 = smov [#allocation7]   ;;  %s5882_s26 = scalar_lea.hbm %s7456_s4, 1024 }
  0x4a   : > { %s349_s28 = sshll.u32 %s6050_s18, 4  ;;  %p5883_p6 = scmp.ne.s32.totalorder %s7456_s4, %s5882_s26  ;;  %s350_s28 = int_to_ptr.vmem [resolvable:$true] %s349_s28 }
  0x4b   : > { %p5889_p5 = scmp.lt.u32.totalorder %s5882_s26, %s7456_s4 }
  0x4c   : > { %p5885_p10 = pnand %p5883_p6, %p6203_p13 }
  0x4e   : > { %p5886_p3 = pneg %p5885_p10 }
  0x50   : > { %p5891_p7 = pnand %p5889_p5, %p5886_p3 }
  0x52   : > { %5894 = shalt.err (!%p5891_p7)
}
  0x53   : > { %s5895_s16 = scalar_lea.vmem %s350_s28, 1024  ;;  %p5903_p2 = scmp.lt.s32.totalorder %s350_s28, %s350_s28 }
  0x54   : > { %p5896_p9 = scmp.ne.s32.totalorder %s350_s28, %s5895_s16  ;;  %p5904_p1 = scmp.lt.s32.totalorder %s5895_s16, %s5895_s16 }
  0x56   : > { %p5898_p12 = pnand %p5896_p9, %p6203_p13  ;;  %p5905_p4 = por %p5904_p1, %p5903_p2 }
  0x58   : > { %p5899_p0 = pneg %p5898_p12 }
  0x5a   : > { %p5906_p8 = pnand %p5905_p4, %p5899_p0 }
  0x5c   : > { %5909 = shalt.err (!%p5906_p8)
}
  0x5d   : > { %s6051_s11 = smov 64   ;;  %s6052_s9 = smov 4  }
  0x5e   : > { %5513 = dma.hbm_to_vmem [thread:$0]  (!%p6189_p11), %s7456_s4, 1024, %s350_s28, [#allocation6], %s6051_s11, %s6051_s11, %s6052_s9  }
  0x5f   : > { %s6053_s21 = smov [#allocation10]   ;;  %s5910_s26 = scalar_lea.hbm %s7462_s10, 4096 }
  0x60   : > { %s387_s18 = sshll.u32 %s6053_s21, 4  ;;  %p5911_p4 = scmp.ne.s32.totalorder %s7462_s10, %s5910_s26  ;;  %s388_s18 = int_to_ptr.vmem [resolvable:$true] %s387_s18 }
  0x61   : > { %p5917_p10 = scmp.lt.u32.totalorder %s5910_s26, %s7462_s10 }
  0x62   : > { %p5913_p8 = pnand %p5911_p4, %p6203_p13 }
  0x64   : > { %p5914_p6 = pneg %p5913_p8 }
  0x66   : > { %p5919_p3 = pnand %p5917_p10, %p5914_p6 }
  0x68   : > { %5922 = shalt.err (!%p5919_p3)
}
  0x69   : > { %s5923_s28 = scalar_lea.vmem %s388_s18, 4096  ;;  %p5931_p12 = scmp.lt.s32.totalorder %s388_s18, %s388_s18 }
  0x6a   : > { %p5924_p5 = scmp.ne.s32.totalorder %s388_s18, %s5923_s28  ;;  %p5932_p0 = scmp.lt.s32.totalorder %s5923_s28, %s5923_s28 }
  0x6c   : > { %p5926_p7 = pnand %p5924_p5, %p6203_p13  ;;  %p5933_p2 = por %p5932_p0, %p5931_p12 }
  0x6e   : > { %p5927_p9 = pneg %p5926_p7 }
  0x70   : > { %p5934_p1 = pnand %p5933_p2, %p5927_p9 }
  0x72   : > { %5937 = shalt.err (!%p5934_p1)
}
  0x73   : > { %5519 = dma.hbm_to_vmem [thread:$0]  (!%p6189_p11), %s7462_s10, 4096, %s388_s18, [#allocation9], %s6051_s11, %s6051_s11, %s6052_s9  }
  0x74   : > { %s6284_s30 = sadd.s32 1, %s6042_s24   ;;  %s37_s21 = sadd.s32 1, %s6038_s23 }
  0x75   : > { %s34_s14 = ssub.s32 %s6042_s24, %s6284_s30  ;;  %p44_p13 = scmp.ne.s32.totalorder %s6038_s23, %s6034_s22 }
  0x76   : > { %p35_p4 = scmp.eq.s32.totalorder %s34_s14, 0  ;;  %p45_p8 = scmp.eq.s32.totalorder %s6042_s24, 0 }
  0x77   : > { %p7486_p6 = scmp.eq.s32.totalorder %s6159_s25, 1  ;;  %p5532_p3 = scmp.lt.s32.totalorder %s6042_s24, 2 }
  0x78   : > { %s6300_s20 = scalar_select %p35_p4, %s6038_s23, %s37_s21  }
  0x79   : > { %p6294_p10 = por %p7486_p6, %p44_p13  ;;  %p46_p5 = por %p45_p8, %p44_p13 }
  0x7a   : > { %s404_s26 = sand.u32 1, %s6038_s23   ;;  %s5255_s11 = sshll.u32 %s6042_s24, 8 }
  0x7b   : > { %s5058_s15 = sshll.u32 %s404_s26, 4  ;;  %s6307_s17 = scalar_lea.hbm %s7452_s0, %s5255_s11 }
  0x7c   : > { %s408_s13 = scalar_lea.vmem [#allocation2], %s5058_s15  ;;  %p6311_p11 = pnand %p5532_p3, %p46_p5 }
  0x7d   : > { %s415_s16 = sshll.u32 %s408_s13, 4  ;;  %s6315_s3 = scalar_lea.sflag [#allocation3], %s404_s26  ;;  %s6309_s16 = int_to_ptr.vmem [resolvable:$true] %s415_s16 }
  0x7e   : > { %s5938_s12 = scalar_lea.hbm %s6307_s17, 256  ;;  %p5940_p9 = pneg %p6311_p11 }
  0x7f   : > { %p5939_p7 = scmp.ne.s32.totalorder %s6307_s17, %s5938_s12  ;;  %s5943_s15 = scalar_lea.hbm %s7452_s0, 512 }
  0x80   : > { %p5944_p2 = scmp.lt.u32.totalorder %s6307_s17, %s7452_s0  ;;  %p5945_p1 = scmp.lt.u32.totalorder %s5943_s15, %s5938_s12 }
  0x81   : > { %p5941_p12 = pnand %p5940_p9, %p5939_p7  ;;  %p5947_p4 = scmp.lt.u32.totalorder %s5938_s12, %s6307_s17 }
  0x82   : > { %p5946_p13 = por %p5945_p1, %p5944_p2 }
  0x83   : > { %p5942_p0 = pneg %p5941_p12 }
  0x84   : > { %p5948_p8 = por %p5947_p4, %p5946_p13 }
  0x86   : > { %p5949_p6 = pnand %p5948_p8, %p5942_p0 }
  0x88   : > { %5952 = shalt.err (!%p5949_p6)
}
  0x89   : > { %s5953_s26 = scalar_lea.vmem %s6309_s16, 256  ;;  %s6054_s18 = smov [#allocation2]  }
  0x8a   : > { %p5954_p3 = scmp.ne.s32.totalorder %s6309_s16, %s5953_s26  ;;  %s5958_s13 = sshll.u32 %s6054_s18, 4  ;;  %s5959_s13 = int_to_ptr.vmem [resolvable:$false] %s5958_s13 }
  0x8b   : > { %s5960_s21 = scalar_lea.vmem %s5959_s13, 512  ;;  %p5961_p12 = scmp.lt.s32.totalorder %s6309_s16, %s5959_s13 }
  0x8c   : > { %p5956_p5 = pnand %p5954_p3, %p5940_p9  ;;  %p5962_p2 = scmp.lt.s32.totalorder %s5960_s21, %s5953_s26 }
  0x8e   : > { %p5957_p7 = pneg %p5956_p5  ;;  %p5963_p1 = por %p5962_p2, %p5961_p12 }
  0x90   : > { %p5964_p13 = pnand %p5963_p1, %p5957_p7 }
  0x92   : > { %5967 = shalt.err (!%p5964_p13)
}
  0x93   : > { %s6055_s12 = smov 128   ;;  %s6056_s14 = smov 8  }
  0x94   : > { %5523 = dma.hbm_to_vmem [thread:$0]  (!%p6311_p11), %s6307_s17, 256, %s6309_s16, %s6315_s3, %s6055_s12, %s6055_s12, %s6056_s14  }
  0x95   : > { %p7489_p9 = scmp.ne.s32.totalorder %s7482_s29, 0 }
  0x96   : > { %s6346_s15 = sand.u32 (!%p7489_p9), 1, %s6034_s22   ;;  %p7490_p0 = scmp.ne.s32.totalorder (!%p7489_p9), %s7479_s27, 0 }
  0x97   : > { %427 = sbr.rel (%p7489_p9) target bundleno = 2705 (0xa91), region = 68  ;;  %s5062_s11 = sshll.u32 (!%p7489_p9), %s6346_s15, 4 }
  0x98   : > { %s430_s9 = scalar_lea.sflag (!%p7489_p9), [#allocation3], %s6346_s15  ;;  %s6352_s26 = scalar_lea.vmem (!%p7489_p9), [#allocation2], %s5062_s11 }
  0x9e   : > { %6013 = dma.done.wait (%p7490_p0), %s430_s9, 256  }
  0x9f   : > { %6015 = vsyncadd (%p7490_p0), %s430_s9, 4294967040  ;;  %p7491_p11 = scmp.eq.s32.totalorder %s6159_s25, 0 }
  0xa1   : > { %6017 = dma.done.wait (%p7491_p11), [#allocation6], 4096   ;;  %p7492_p4 = pmov %p7491_p11 }
  0xa3   : > { %6019 = vsyncadd (%p7492_p4), [#allocation6], 4294963200  ;;  %p7493_p8 = pmov %p7492_p4 }
  0xa4   : > { %p7494_p6 = pmov %p7492_p4 }
  0xa5   : > { %6021 = dma.done.wait (%p7493_p8), [#allocation9], 8192  }
  0xa6   : > { %6023 = vsyncadd (%p7494_p6), [#allocation9], 4294959104  ;;  %v491_v0 = vld [vmem:[%s6352_s26] sm:$0xff]  ;;  %v492_v1 = vld [vmem:[%s6352_s26 + $0x8] sm:$0xff]  ;;  %v6057_v4 = vmov 0.0   ;;  %v7471_v30 = vmov 0   ;;  %v7473_v63 = vlaneseq }
  0xa7   : > { %495 = vadd.xlane.f32.xlu0 %v491_v0  ;;  %v5632_v2 = vld [vmem:[#allocation5 + $0x4] ss:$12 sps:$4 sm:$0xff]   ;;  %v5634_v3 = vld [vmem:[#allocation5] ss:$12 sps:$4 sm:$0xff]   ;;  %5351 = vmatprep.subr.bf16.mxu1 %v6057_v4  ;;  %v5635_v5 = vld [vmem:[#allocation5 + $0x8] ss:$12 sps:$4 sm:$0xff]  }
  0xa8   : > { %v5636_v6 = vld [vmem:[#allocation5 + $0x1c] ss:$12 sps:$4 sm:$0xff]   ;;  %695 = vmatprep.subr.bf16.mxu0 %v5632_v2  ;;  %5352 = vmatpush3.bf16.msra.mxu1 %v5635_v5  ;;  %v5638_v15 = vld [vmem:[#allocation5 + $0x18] ss:$12 sps:$4 sm:$0xff]   ;;  %v5639_v16 = vld [vmem:[#allocation5 + $0x20] ss:$12 sps:$4 sm:$0xff]  }
  0xa9   : > { %696 = vmatpush1.bf16.msra.mxu0 %v5634_v3  ;;  %5353 = vmatprep.subr.bf16.mxu1 %v6057_v4  ;;  %v5640_v17 = vld [vmem:[#allocation5 + $0x34] ss:$12 sps:$4 sm:$0xff]   ;;  %v5642_v18 = vld [vmem:[#allocation5 + $0x30] ss:$12 sps:$4 sm:$0xff]   ;;  %v5643_v19 = vld [vmem:[#allocation5 + $0x38] ss:$12 sps:$4 sm:$0xff]  }
  0xaa   : > { %697 = vmatprep.subr.bf16.mxu0 %v5636_v6  ;;  %v5644_v20 = vld [vmem:[#allocation5 + $0x4c] ss:$12 sps:$4 sm:$0xff]   ;;  %v5646_v21 = vld [vmem:[#allocation5 + $0x48] ss:$12 sps:$4 sm:$0xff]   ;;  %v5647_v22 = vld [vmem:[#allocation5 + $0x50] ss:$12 sps:$4 sm:$0xff]   ;;  %727 = vmatprep.mubr.bf16.mxu0 %v7471_v30 }
  0xab   : > { %497 = vadd.xlane.f32.xlu0 %v492_v1  ;;  %v5648_v23 = vld [vmem:[#allocation5 + $0x64] ss:$12 sps:$4 sm:$0xff]   ;;  %v5650_v24 = vld [vmem:[#allocation5 + $0x60] ss:$12 sps:$4 sm:$0xff]   ;;  %v5651_v25 = vld [vmem:[#allocation5 + $0x68] ss:$12 sps:$4 sm:$0xff]  }
  0xac   : > { %5354 = vmatpush3.bf16.msra.mxu1 %v5639_v16  ;;  %v5652_v26 = vld [vmem:[#allocation5 + $0x7c] ss:$12 sps:$4 sm:$0xff]   ;;  %v5654_v27 = vld [vmem:[#allocation5 + $0x78] ss:$12 sps:$4 sm:$0xff]   ;;  %v5655_v28 = vld [vmem:[#allocation5 + $0x80] ss:$12 sps:$4 sm:$0xff]  }
  0xad   : > { %698 = vmatpush1.bf16.msra.mxu0 %v5638_v15  ;;  %5355 = vmatprep.subr.bf16.mxu1 %v6057_v4  ;;  %v5656_v29 = vld [vmem:[#allocation5 + $0x94] ss:$12 sps:$4 sm:$0xff]   ;;  %vm6059_vm0 = vmmov 0   ;;  %v5658_v31 = vld [vmem:[#allocation5 + $0x90] ss:$12 sps:$4 sm:$0xff]   ;;  %s6060_s28 = smov 112  }
  0xae   : > { %699 = vmatprep.subr.bf16.mxu0 %v5640_v17  ;;  %5367 = vmatprep.mubr.msk.bf16.mxu1 %vm6059_vm0, %v6057_v4  ;;  %v5659_v32 = vld [vmem:[#allocation5 + $0x98] ss:$12 sps:$4 sm:$0xff]   ;;  %v5662_v34 = vld [vmem:[#allocation5 + $0xa8] ss:$12 sps:$4 sm:$0xff]   ;;  %v5663_v35 = vld [vmem:[#allocation5 + $0xb0] ss:$12 sps:$4 sm:$0xff]  }
  0xaf   : > { %v5660_v33 = vld [vmem:[#allocation5 + $0xac] ss:$12 sps:$4 sm:$0xff]   ;;  %v5068_v44 = vld [vmem:[%s7453_s1] ss:$0 sm:$0xff]  ;;  %s6061_s3 = smov 96   ;;  %s6062_s18 = smov 80  }
  0xb0   : > { %5356 = vmatpush3.bf16.msra.mxu1 %v5643_v19  ;;  %v5069_v48 = vld [vmem:[%s7454_s2] ss:$0 sm:$0xff]  ;;  %s6063_s13 = smov 64   ;;  %s6064_s21 = smov 48   ;;  %v6067_v61 = vmov 1983009808  }
  0xb1   : > { %700 = vmatpush1.bf16.msra.mxu0 %v5642_v18  ;;  %5357 = vmatprep.subr.bf16.mxu1 %v6057_v4  ;;  %s6065_s12 = smov 32   ;;  %s6066_s14 = smov 16   ;;  %v826_v62 = vunpack.c.l.s4 %v6067_v61  ;;  %v6068_v2 = vmov 1934713408   ;;  %v6496_v6 = vshrl.u32 %v7473_v63, 7  ;;  %vm2576_vm1 = vcmask 130048  }
  0xb2   : > { %701 = vmatprep.subr.bf16.mxu0 %v5644_v20  ;;  %v890_v3 = vunpack.c.l.s4 %v6068_v2  ;;  %vm4091_vm4 = vcmask 261120   ;;  %vm4094_vm5 = vcmask 392192   ;;  %vm4097_vm6 = vcmask 523264   ;;  %s5256_s27 = sshll.u32 %s6159_s25, 8  ;;  %s7500_s17 = sld [smem:[#allocation21_spill]] }
  0xb3   : > { %v827_v5 = vunpack.c.0.s8 %v826_v62  ;;  %vm4100_vm7 = vcmask 654336   ;;  %vm4103_vm8 = vcmask 785408   ;;  %vm4106_vm9 = vcmask 916480   ;;  %s6070_s25 = smov [#allocation11]  }
  0xb4   : > { %5358 = vmatpush3.bf16.msra.mxu1 %v5647_v22 }
  0xb5   : > { %702 = vmatpush1.bf16.msra.mxu0 %v5646_v21  ;;  %5359 = vmatprep.subr.bf16.mxu1 %v6057_v4 }
  0xb6   : > { %703 = vmatprep.subr.bf16.mxu0 %v5648_v23 }
  0xb8   : > { %5360 = vmatpush3.bf16.msra.mxu1 %v5651_v25  ;;  %s7407_s16 = scalar_lea.hbm %s7500_s17, %s5256_s27 }
  0xb9   : > { %704 = vmatpush1.bf16.msra.mxu0 %v5650_v24  ;;  %5361 = vmatprep.subr.bf16.mxu1 %v6057_v4 }
  0xba   : > { %705 = vmatprep.subr.bf16.mxu0 %v5652_v26 }
  0xbc   : > { %5362 = vmatpush3.bf16.msra.mxu1 %v5655_v28 }
  0xbd   : > { %706 = vmatpush1.bf16.msra.mxu0 %v5654_v27  ;;  %5363 = vmatprep.subr.bf16.mxu1 %v6057_v4 }
  0xbe   : > { %707 = vmatprep.subr.bf16.mxu0 %v5656_v29 }
  0xc0   : > { %5364 = vmatpush3.bf16.msra.mxu1 %v5659_v32 }
  0xc1   : > { %708 = vmatpush1.bf16.msra.mxu0 %v5658_v31  ;;  %5365 = vmatprep.subr.bf16.mxu1 %v6057_v4 }
  0xc2   : > { %709 = vmatprep.subr.bf16.mxu0 %v5660_v33 }
  0xc4   : > { %5366 = vmatpush3.bf16.msra.mxu1 %v5663_v35 }
  0xc5   : > { %710 = vmatpush1.bf16.msra.mxu0 %v5662_v34  ;;  %5371 = vmatprep.subr.bf16.mxu1 %v6057_v4 }
  0xc6   : > { %5395 = vmatprep.subr.bf16.mxu0 %v6057_v4 }
 0x134   : > { %v496_v7 = vpop.xlane.xlu0 %495 }
 0x135   : > { %v500_v8 = vmul.f32 0.0078125, %v496_v7 }
 0x137   : > { %v6370_v9 = vsub.f32 %v491_v0, %v500_v8 }
 0x138   : > { %v498_v10 = vpop.xlane.xlu0 %497 }
 0x139   : > { %v501_v11 = vmul.f32 0.0078125, %v498_v10  ;;  %v504_v12 = vmul.f32 %v6370_v9, %v6370_v9  ;;  %v6501_v10 = vsub.s32 %v827_v5, %v6496_v6 }
 0x13b   : > { %v6374_v13 = vsub.f32 %v492_v1, %v501_v11  ;;  %506 = vadd.xlane.f32.xlu1 %v504_v12 }
 0x13d   : > { %v505_v14 = vmul.f32 %v6374_v13, %v6374_v13 }
 0x13f   : > { %508 = vadd.xlane.f32.xlu1 %v505_v14 }
 0x1c8   : > { %v507_v36 = vpop.xlane.xlu1 %506 }
 0x1c9   : > { %v510_v37 = vmul.f32 0.0078125, %v507_v36 }
 0x1cb   : > { %v512_v38 = vadd.f32 1e-05, %v510_v37 }
 0x1cc   : > { %v509_v39 = vpop.xlane.xlu1 %508 }
 0x1cd   : > { %5752 = vrsqrt.f32 %v512_v38  ;;  %v511_v40 = vmul.f32 0.0078125, %v509_v39 }
 0x1cf   : > { %v513_v41 = vadd.f32 1e-05, %v511_v40 }
 0x1d1   : > { %5754 = vrsqrt.f32 %v513_v41 }
 0x1d7   : > { %v5753_v42 = vpop.eup %5752 }
 0x1d8   : > { %v516_v43 = vmul.f32 %v5753_v42, %v6370_v9  ;;  %v891_v9 = vunpack.c.0.s8 %v890_v3 }
 0x1da   : > { %v524_v47 = vmul.f32 %v5068_v44, %v516_v43  ;;  %v6506_v17 = vsub.s32 %v891_v9, %v6496_v6 }
 0x1db   : > { %v5755_v45 = vpop.eup %5754 }
 0x1dc   : > { %v517_v46 = vmul.f32 %v5755_v45, %v6374_v13  ;;  %v532_v50 = vadd.f32 %v5069_v48, %v524_v47 }
 0x1de   : > { %v525_v49 = vmul.f32 %v5068_v44, %v517_v46 }
 0x1e0   : > { %v533_v51 = vadd.f32 %v5069_v48, %v525_v49 }
 0x1e2   : > { %v534_v52 = vpack.c.bf16 %v533_v51, %v532_v50 }
 0x1e4   : > { %728 = vmatmul.mubr.bf16.vlgmr.msra.gmra.mrb[0].mxu0 %v534_v52  ;;  %5368 = vmatmul.mubr.bf16.vlgmr.msra.gmra.mrb[0].mxu1 %v534_v52 }
 0x1e5   : > { %5373 = vmatprep.mubr.msk.bf16.mxu1 %vm6059_vm0, %v6057_v4  ;;  %5397 = vmatprep.mubr.msk.bf16.mxu0 %vm6059_vm0, %v6057_v4 }
 0x2b7   : > { %v6401_v53 = vpop.f32.mrb[0].mxu0  ;;  %v6403_v54 = vpop.f32.mrb[0].mxu1 }
 0x2b8   : > { %v5369_v55 = vpop.f32.mrb[1].mxu1  ;;  %781 = vrot.lane.b32.xlu0 %v6401_v53, %s6060_s28  ;;  %v6407_v56 = vpop.f32.mrb[1].mxu0 }
 0x2b9   : > { %v6409_v57 = vpop.f32.mrb[2].mxu1  ;;  %1383 = vrot.lane.b32.xlu1 %v6407_v56, %s6061_s3  ;;  %v6413_v58 = vpop.f32.mrb[2].mxu0 }
 0x2ba   : > { %v6415_v59 = vpop.f32.mrb[3].mxu0  ;;  %v5370_v60 = vpop.f32.mrb[3].mxu1 }
 0x2bc   : > { %1377 = vrot.lane.b32.xlu0 %v6407_v56, %s6060_s28 }
 0x2bd   : > { %783 = vrot.lane.b32.xlu1 %v6413_v58, %s6060_s28 }
 0x2c0   : > { %1389 = vrot.lane.b32.xlu0 %v6407_v56, %s6062_s18 }
 0x2c1   : > { %1379 = vrot.lane.b32.xlu1 %v6415_v59, %s6060_s28 }
 0x2c4   : > { %787 = vrot.lane.b32.xlu0 %v6401_v53, %s6061_s3 }
 0x2c5   : > { %1385 = vrot.lane.b32.xlu1 %v6415_v59, %s6061_s3 }
 0x2c8   : > { %793 = vrot.lane.b32.xlu0 %v6401_v53, %s6062_s18 }
 0x2c9   : > { %1391 = vrot.lane.b32.xlu1 %v6415_v59, %s6062_s18 }
 0x2cc   : > { %1395 = vrot.lane.b32.xlu0 %v6407_v56, %s6063_s13 }
 0x2cd   : > { %789 = vrot.lane.b32.xlu1 %v6413_v58, %s6061_s3 }
 0x2d0   : > { %1401 = vrot.lane.b32.xlu0 %v6407_v56, %s6064_s21 }
 0x2d1   : > { %795 = vrot.lane.b32.xlu1 %v6413_v58, %s6062_s18 }
 0x2d4   : > { %1407 = vrot.lane.b32.xlu0 %v6407_v56, %s6065_s12 }
 0x2d5   : > { %801 = vrot.lane.b32.xlu1 %v6413_v58, %s6063_s13 }
 0x2d8   : > { %1413 = vrot.lane.b32.xlu0 %v6407_v56, %s6066_s14 }
 0x2d9   : > { %807 = vrot.lane.b32.xlu1 %v6413_v58, %s6064_s21 }
 0x2dc   : > { %799 = vrot.lane.b32.xlu0 %v6401_v53, %s6063_s13 }
 0x2dd   : > { %1397 = vrot.lane.b32.xlu1 %v6415_v59, %s6063_s13 }
 0x2e0   : > { %805 = vrot.lane.b32.xlu0 %v6401_v53, %s6064_s21 }
 0x2e1   : > { %1403 = vrot.lane.b32.xlu1 %v6415_v59, %s6064_s21 }
 0x2e4   : > { %811 = vrot.lane.b32.xlu0 %v6401_v53, %s6065_s12 }
 0x2e5   : > { %1409 = vrot.lane.b32.xlu1 %v6415_v59, %s6065_s12 }
 0x2e8   : > { %817 = vrot.lane.b32.xlu0 %v6401_v53, %s6066_s14 }
 0x2e9   : > { %1415 = vrot.lane.b32.xlu1 %v6415_v59, %s6066_s14 }
 0x2ec   : > { %1973 = vrot.lane.b32.xlu0 %v6403_v54, %s6060_s28 }
 0x2ed   : > { %813 = vrot.lane.b32.xlu1 %v6413_v58, %s6065_s12 }
 0x2f0   : > { %1985 = vrot.lane.b32.xlu0 %v6403_v54, %s6062_s18 }
 0x2f1   : > { %819 = vrot.lane.b32.xlu1 %v6413_v58, %s6066_s14 }
 0x2f4   : > { %1991 = vrot.lane.b32.xlu0 %v6403_v54, %s6063_s13 }
 0x2f5   : > { %1975 = vrot.lane.b32.xlu1 %v6409_v57, %s6060_s28 }
 0x2f8   : > { %2003 = vrot.lane.b32.xlu0 %v6403_v54, %s6065_s12 }
 0x2f9   : > { %1979 = vrot.lane.b32.xlu1 %v6403_v54, %s6061_s3 }
 0x2fc   : > { %2009 = vrot.lane.b32.xlu0 %v6403_v54, %s6066_s14 }
 0x2fd   : > { %1981 = vrot.lane.b32.xlu1 %v6409_v57, %s6061_s3 }
 0x301   : > { %1987 = vrot.lane.b32.xlu1 %v6409_v57, %s6062_s18 }
 0x305   : > { %1993 = vrot.lane.b32.xlu1 %v6409_v57, %s6063_s13 }
 0x309   : > { %1997 = vrot.lane.b32.xlu1 %v6403_v54, %s6064_s21 }
 0x30d   : > { %1999 = vrot.lane.b32.xlu1 %v6409_v57, %s6064_s21 }
 0x311   : > { %2005 = vrot.lane.b32.xlu1 %v6409_v57, %s6065_s12 }
 0x32a   : > { %v782_v0 = vpop.permute.xlu0 %781 }
 0x32b   : > { %v1384_v1 = vpop.permute.xlu1 %1383 }
 0x32c   : > { %v1419_v11 = vcombine.low %v6407_v56, %v1384_v1  ;;  %v1420_v12 = vcombine.high %v6407_v56, %v1384_v1 }
 0x32e   : > { %v1378_v7 = vpop.permute.xlu0 %1377  ;;  %v1427_v18 = vrot.slane %v1419_v11, %v6501_v10  ;;  %v1434_v19 = vrot.slane %v1420_v12, %v6501_v10 }
 0x32f   : > { %v6498_v8 = vpop.permute.xlu1 %783 }
 0x332   : > { %v1390_v13 = vpop.permute.xlu0 %1389 }
 0x333   : > { %v1435_v14 = vcombine.low %v1378_v7, %v1390_v13  ;;  %v1436_v15 = vcombine.high %v1378_v7, %v1390_v13  ;;  %v1380_v16 = vpop.permute.xlu1 %1379 }
 0x335   : > { %v1443_v20 = vrot.slane %v1435_v14, %v6501_v10  ;;  %v1450_v21 = vrot.slane %v1436_v15, %v6501_v10 }
 0x336   : > { %v788_v22 = vpop.permute.xlu0 %787 }
 0x337   : > { %v1483_v23 = vcombine.low %v1427_v18, %v1443_v20  ;;  %v1484_v24 = vcombine.high %v1427_v18, %v1443_v20  ;;  %v1499_v25 = vcombine.low %v1434_v19, %v1450_v21  ;;  %v1500_v26 = vcombine.high %v1434_v19, %v1450_v21  ;;  %v1386_v27 = vpop.permute.xlu1 %1385 }
 0x338   : > { %v823_v28 = vcombine.low %v6401_v53, %v788_v22  ;;  %v824_v29 = vcombine.high %v6401_v53, %v788_v22  ;;  %v1555_v31 = vcombine.low %v6415_v59, %v1386_v27  ;;  %v1556_v32 = vcombine.high %v6415_v59, %v1386_v27 }
 0x339   : > { %v1491_v33 = vrot.slane %v1483_v23, %v6506_v17  ;;  %v1498_v34 = vrot.slane %v1484_v24, %v6506_v17  ;;  %v1507_v35 = vrot.slane %v1499_v25, %v6506_v17  ;;  %v1514_v36 = vrot.slane %v1500_v26, %v6506_v17 }
 0x33a   : > { %v794_v37 = vpop.permute.xlu0 %793  ;;  %v831_v47 = vrot.slane %v823_v28, %v6501_v10  ;;  %v838_v48 = vrot.slane %v824_v29, %v6501_v10  ;;  %v1563_v49 = vrot.slane %v1555_v31, %v6501_v10  ;;  %v1570_v50 = vrot.slane %v1556_v32, %v6501_v10 }
 0x33b   : > { %v5110_v38 = vcombine.low %v1491_v33, %v1498_v34  ;;  %v5112_v39 = vcombine.high %v1491_v33, %v1498_v34  ;;  %v5114_v40 = vcombine.low %v1507_v35, %v1514_v36  ;;  %v5116_v41 = vcombine.high %v1507_v35, %v1514_v36  ;;  %v1392_v42 = vpop.permute.xlu1 %1391 }
 0x33c   : > { %v839_v43 = vcombine.low %v782_v0, %v794_v37  ;;  %v840_v44 = vcombine.high %v782_v0, %v794_v37  ;;  %v1571_v45 = vcombine.low %v1380_v16, %v1392_v42  ;;  %v1572_v46 = vcombine.high %v1380_v16, %v1392_v42 }
 0x33d   : > { %v6531_v59 = vrot.slane %v5110_v38, %v6501_v10  ;;  %v6534_v60 = vrot.slane %v5112_v39, %v6501_v10  ;;  %v6537_v61 = vrot.slane %v5114_v40, %v6501_v10  ;;  %v6540_v62 = vrot.slane %v5116_v41, %v6501_v10 }
 0x33e   : > { %v847_v51 = vrot.slane %v839_v43, %v6501_v10  ;;  %v854_v52 = vrot.slane %v840_v44, %v6501_v10  ;;  %v1579_v53 = vrot.slane %v1571_v45, %v6501_v10  ;;  %v1586_v55 = vrot.slane %v1572_v46, %v6501_v10  ;;  %v6528_v56 = vpop.permute.xlu0 %1395 }
 0x33f   : > { %v790_v0 = vpop.permute.xlu1 %789  ;;  %v1755_v39 = vcombine.low %v6531_v59, %v6534_v60  ;;  %v1787_v40 = vcombine.low %v6537_v61, %v6540_v62  ;;  %v1756_v41 = vcombine.high %v6531_v59, %v6534_v60 }
 0x340   : > { %v887_v1 = vcombine.low %v831_v47, %v847_v51  ;;  %v888_v2 = vcombine.high %v831_v47, %v847_v51  ;;  %v903_v3 = vcombine.low %v838_v48, %v854_v52  ;;  %v904_v5 = vcombine.high %v838_v48, %v854_v52 }
 0x341   : > { %v1619_v7 = vcombine.low %v1563_v49, %v1579_v53  ;;  %v1620_v9 = vcombine.high %v1563_v49, %v1579_v53  ;;  %v1635_v11 = vcombine.low %v1570_v50, %v1586_v55  ;;  %v1636_v12 = vcombine.high %v1570_v50, %v1586_v55 }
 0x342   : > { %v895_v13 = vrot.slane %v887_v1, %v6506_v17  ;;  %v902_v14 = vrot.slane %v888_v2, %v6506_v17  ;;  %v911_v15 = vrot.slane %v903_v3, %v6506_v17  ;;  %v918_v16 = vrot.slane %v904_v5, %v6506_v17  ;;  %v1402_v18 = vpop.permute.xlu0 %1401 }
 0x343   : > { %v1627_v19 = vrot.slane %v1619_v7, %v6506_v17  ;;  %v1634_v20 = vrot.slane %v1620_v9, %v6506_v17  ;;  %v1643_v21 = vrot.slane %v1635_v11, %v6506_v17  ;;  %v1650_v22 = vrot.slane %v1636_v12, %v6506_v17  ;;  %v796_v23 = vpop.permute.xlu1 %795 }
 0x344   : > { %v5094_v24 = vcombine.low %v895_v13, %v902_v14  ;;  %v5096_v25 = vcombine.high %v895_v13, %v902_v14  ;;  %v5098_v26 = vcombine.low %v911_v15, %v918_v16  ;;  %v5100_v27 = vcombine.high %v911_v15, %v918_v16 }
 0x345   : > { %v5118_v28 = vcombine.low %v1627_v19, %v1634_v20  ;;  %v5120_v29 = vcombine.high %v1627_v19, %v1634_v20  ;;  %v5122_v31 = vcombine.low %v1643_v21, %v1650_v22  ;;  %v5124_v32 = vcombine.high %v1643_v21, %v1650_v22 }
 0x346   : > { %v6551_v33 = vrot.slane %v5094_v24, %v6501_v10  ;;  %v6554_v34 = vrot.slane %v5096_v25, %v6501_v10  ;;  %v6557_v35 = vrot.slane %v5098_v26, %v6501_v10  ;;  %v6560_v36 = vrot.slane %v5100_v27, %v6501_v10  ;;  %v1408_v37 = vpop.permute.xlu0 %1407 }
 0x347   : > { %v6562_v38 = vpop.permute.xlu1 %801  ;;  %v6573_v43 = vrot.slane %v5118_v28, %v6501_v10  ;;  %v6576_v44 = vrot.slane %v5120_v29, %v6501_v10  ;;  %v6579_v45 = vrot.slane %v5122_v31, %v6501_v10  ;;  %v6582_v46 = vrot.slane %v5124_v32, %v6501_v10 }
 0x348   : > { %v959_v47 = vcombine.low %v6413_v58, %v790_v0  ;;  %v960_v48 = vcombine.high %v6413_v58, %v790_v0  ;;  %v975_v49 = vcombine.low %v6498_v8, %v796_v23  ;;  %v976_v50 = vcombine.high %v6498_v8, %v796_v23 }
 0x349   : > { %v1159_v51 = vcombine.low %v6551_v33, %v6554_v34  ;;  %v1160_v52 = vcombine.high %v6551_v33, %v6554_v34  ;;  %v1191_v53 = vcombine.low %v6557_v35, %v6560_v36  ;;  %v1192_v55 = vcombine.high %v6557_v35, %v6560_v36 }
 0x34a   : > { %v1414_v1 = vpop.permute.xlu0 %1413  ;;  %v967_v2 = vrot.slane %v959_v47, %v6501_v10  ;;  %v974_v58 = vrot.slane %v960_v48, %v6501_v10  ;;  %v983_v0 = vrot.slane %v975_v49, %v6501_v10  ;;  %v990_v8 = vrot.slane %v976_v50, %v6501_v10 }
 0x34b   : > { %v6600_v3 = vpop.permute.xlu1 %807  ;;  %v1451_v5 = vcombine.low %v6528_v56, %v1408_v37  ;;  %v1452_v7 = vcombine.high %v6528_v56, %v1408_v37  ;;  %v1467_v9 = vcombine.low %v1402_v18, %v1414_v1  ;;  %v1468_v11 = vcombine.high %v1402_v18, %v1414_v1 }
 0x34c   : > { %v1023_v12 = vcombine.low %v967_v2, %v983_v0  ;;  %v1024_v13 = vcombine.high %v967_v2, %v983_v0  ;;  %v1039_v14 = vcombine.low %v974_v58, %v990_v8  ;;  %v1040_v15 = vcombine.high %v974_v58, %v990_v8 }
 0x34d   : > { %v1459_v16 = vrot.slane %v1451_v5, %v6501_v10  ;;  %v1466_v19 = vrot.slane %v1452_v7, %v6501_v10  ;;  %v1475_v20 = vrot.slane %v1467_v9, %v6501_v10  ;;  %v1482_v21 = vrot.slane %v1468_v11, %v6501_v10 }
 0x34e   : > { %v800_v22 = vpop.permute.xlu0 %799  ;;  %v1031_v23 = vrot.slane %v1023_v12, %v6506_v17  ;;  %v1038_v24 = vrot.slane %v1024_v13, %v6506_v17  ;;  %v1047_v56 = vrot.slane %v1039_v14, %v6506_v17  ;;  %v1054_v18 = vrot.slane %v1040_v15, %v6506_v17 }
 0x34f   : > { %v6612_v25 = vpop.permute.xlu1 %1397  ;;  %v1515_v26 = vcombine.low %v1459_v16, %v1475_v20  ;;  %v1516_v27 = vcombine.high %v1459_v16, %v1475_v20  ;;  %v1531_v28 = vcombine.low %v1466_v19, %v1482_v21  ;;  %v1532_v29 = vcombine.high %v1466_v19, %v1482_v21 }
 0x350   : > { %v5102_v31 = vcombine.low %v1031_v23, %v1038_v24  ;;  %v5104_v32 = vcombine.high %v1031_v23, %v1038_v24  ;;  %v5106_v33 = vcombine.low %v1047_v56, %v1054_v18  ;;  %v5108_v34 = vcombine.high %v1047_v56, %v1054_v18 }
 0x351   : > { %v1523_v35 = vrot.slane %v1515_v26, %v6506_v17  ;;  %v1530_v36 = vrot.slane %v1516_v27, %v6506_v17  ;;  %v1539_v37 = vrot.slane %v1531_v28, %v6506_v17  ;;  %v1546_v47 = vrot.slane %v1532_v29, %v6506_v17 }
 0x352   : > { %v806_v48 = vpop.permute.xlu0 %805  ;;  %v6619_v49 = vrot.slane %v5102_v31, %v6501_v10  ;;  %v6622_v50 = vrot.slane %v5104_v32, %v6501_v10  ;;  %v6625_v1 = vrot.slane %v5106_v33, %v6501_v10  ;;  %v6628_v2 = vrot.slane %v5108_v34, %v6501_v10 }
 0x353   : > { %v1404_v58 = vpop.permute.xlu1 %1403  ;;  %v6631_v0 = vrot.slane %v1159_v51, %v6506_v17  ;;  %v6634_v8 = vrot.slane %v1160_v52, %v6506_v17  ;;  %v5111_v5 = vcombine.low %v1523_v35, %v1530_v36  ;;  %v5113_v7 = vcombine.high %v1523_v35, %v1530_v36 }
 0x354   : > { %v1295_v9 = vcombine.low %v6619_v49, %v6622_v50  ;;  %v1327_v11 = vcombine.low %v6625_v1, %v6628_v2  ;;  %v5115_v12 = vcombine.low %v1539_v37, %v1546_v47  ;;  %v5117_v13 = vcombine.high %v1539_v37, %v1546_v47 }
 0x355   : > { %v6641_v14 = vrot.slane %v1191_v53, %v6506_v17  ;;  %v6644_v51 = vrot.slane %v1192_v55, %v6506_v17  ;;  %v1296_v52 = vcombine.high %v6619_v49, %v6622_v50  ;;  %v1328_v15 = vcombine.high %v6625_v1, %v6628_v2 }
 0x356   : > { %v812_v16 = vpop.permute.xlu0 %811  ;;  %v6651_v19 = vrot.slane %v1295_v9, %v6506_v17  ;;  %v6654_v20 = vrot.slane %v1327_v11, %v6506_v17  ;;  %v6657_v21 = vrot.slane %v5111_v5, %v6501_v10  ;;  %v6660_v53 = vrot.slane %v5113_v7, %v6501_v10 }
 0x357   : > { %v1410_v55 = vpop.permute.xlu1 %1409  ;;  %v1763_v23 = vrot.slane %v1755_v39, %v6506_v17  ;;  %v1795_v24 = vrot.slane %v1787_v40, %v6506_v17  ;;  %v1891_v56 = vcombine.low %v6573_v43, %v6576_v44  ;;  %v1923_v18 = vcombine.low %v6579_v45, %v6582_v46 }
 0x358   : > { %v6675_v26 = vrot.slane %v5115_v12, %v6501_v10  ;;  %v6678_v27 = vrot.slane %v5117_v13, %v6501_v10  ;;  %v855_v28 = vcombine.low %v800_v22, %v812_v16  ;;  %v856_v29 = vcombine.high %v800_v22, %v812_v16 }
 0x359   : > { %v1899_v39 = vrot.slane %v1891_v56, %v6506_v17  ;;  %v1931_v31 = vrot.slane %v1923_v18, %v6506_v17  ;;  %v1587_v40 = vcombine.low %v6612_v25, %v1410_v55  ;;  %v1588_v32 = vcombine.high %v6612_v25, %v1410_v55 }
 0x35a   : > { %v818_v33 = vpop.permute.xlu0 %817  ;;  %v1819_v34 = vcombine.low %v1763_v23, %v1795_v24  ;;  %v863_v35 = vrot.slane %v855_v28, %v6501_v10  ;;  %v870_v36 = vrot.slane %v856_v29, %v6501_v10  ;;  %v1223_v37 = vcombine.low %v6631_v0, %v6641_v14 }
 0x35b   : > { %v1416_v47 = vpop.permute.xlu1 %1415  ;;  %v1955_v5 = vcombine.low %v1899_v39, %v1931_v31  ;;  %v1359_v22 = vcombine.low %v6651_v19, %v6654_v20  ;;  %v1820_v7 = vcombine.high %v1763_v23, %v1795_v24  ;;  %v1956_v9 = vcombine.high %v1899_v39, %v1931_v31 }
 0x35c   : > { %v871_v11 = vcombine.low %v806_v48, %v818_v33  ;;  %v872_v12 = vcombine.high %v806_v48, %v818_v33  ;;  %v1603_v13 = vcombine.low %v1404_v58, %v1416_v47  ;;  %v1604_v25 = vcombine.high %v1404_v58, %v1416_v47 }
 0x35d   : > { %v1963_v16 = vpack.c.bf16 %v1955_v5, %v1819_v34  ;;  %v1595_v55 = vrot.slane %v1587_v40, %v6501_v10  ;;  %v1367_v56 = vpack.c.bf16 %v1359_v22, %v1223_v37  ;;  %v1964_v18 = vpack.c.bf16 %v1956_v9, %v1820_v7 }
 0x35e   : > { %v879_v28 = vrot.slane %v871_v11, %v6501_v10  ;;  %v886_v29 = vrot.slane %v872_v12, %v6501_v10  ;;  %v1611_v30 = vrot.slane %v1603_v13, %v6501_v10  ;;  %v1618_v63 = vrot.slane %v1604_v25, %v6501_v10  ;;  %v6695_v42 = vpop.permute.xlu0 %1973 }
 0x35f   : > { %v814_v23 = vpop.permute.xlu1 %813  ;;  %v2581_v48 = vsel %vm2576_vm1, %v1963_v16, 0  ;;  %v1602_v58 = vrot.slane %v1588_v32, %v6501_v10 }
 0x360   : > { %v991_v24 = vcombine.low %v6562_v38, %v814_v23  ;;  %v992_v39 = vcombine.high %v6562_v38, %v814_v23  ;;  %5372 = vmatpush3.bf16.xpose.msra.mxu1 %v2581_v48  ;;  %v919_v31 = vcombine.low %v863_v35, %v879_v28  ;;  %v920_v40 = vcombine.high %v863_v35, %v879_v28 }
 0x361   : > { %v935_v33 = vcombine.low %v870_v36, %v886_v29  ;;  %v936_v34 = vcombine.high %v870_v36, %v886_v29  ;;  %5377 = vmatprep.subr.bf16.mxu1 %v6057_v4  ;;  %v1651_v37 = vcombine.low %v1595_v55, %v1611_v30  ;;  %v1652_v47 = vcombine.high %v1595_v55, %v1611_v30 }
 0x362   : > { %v1667_v5 = vcombine.low %v1602_v58, %v1618_v63  ;;  %v1668_v22 = vcombine.high %v1602_v58, %v1618_v63  ;;  %v927_v7 = vrot.slane %v919_v31, %v6506_v17  ;;  %v934_v9 = vrot.slane %v920_v40, %v6506_v17  ;;  %v6710_v55 = vpop.permute.xlu0 %1985 }
 0x363   : > { %v943_v32 = vrot.slane %v935_v33, %v6506_v17  ;;  %v950_v11 = vrot.slane %v936_v34, %v6506_v17  ;;  %v820_v38 = vpop.permute.xlu1 %819  ;;  %v1659_v12 = vrot.slane %v1651_v37, %v6506_v17  ;;  %v1666_v35 = vrot.slane %v1652_v47, %v6506_v17 }
 0x364   : > { %v1675_v36 = vrot.slane %v1667_v5, %v6506_v17  ;;  %v1682_v13 = vrot.slane %v1668_v22, %v6506_v17  ;;  %v5095_v30 = vcombine.low %v927_v7, %v934_v9  ;;  %v5097_v25 = vcombine.high %v927_v7, %v934_v9 }
 0x365   : > { %v5099_v63 = vcombine.low %v943_v32, %v950_v11  ;;  %v5101_v16 = vcombine.high %v943_v32, %v950_v11  ;;  %v5119_v28 = vcombine.low %v1659_v12, %v1666_v35  ;;  %v5121_v29 = vcombine.high %v1659_v12, %v1666_v35 }
 0x366   : > { %v5123_v23 = vcombine.low %v1675_v36, %v1682_v13  ;;  %v5125_v48 = vcombine.high %v1675_v36, %v1682_v13  ;;  %v1110_v58 = vrot.slane %v5095_v30, %v6501_v10  ;;  %v1126_v31 = vrot.slane %v5097_v25, %v6501_v10  ;;  %v6753_v9 = vpop.permute.xlu0 %1991 }
 0x367   : > { %v1142_v40 = vrot.slane %v5099_v63, %v6501_v10  ;;  %v1158_v33 = vrot.slane %v5101_v16, %v6501_v10  ;;  %v6720_v34 = vrot.slane %v1296_v52, %v6506_v17  ;;  %v6726_v37 = vrot.slane %v1328_v15, %v6506_v17  ;;  %5374 = vmatmul.mubr.msk.bf16.vlgmr.msra.gmra.mrb[4].mxu1 %vm2576_vm1, %v1367_v56  ;;  %v6732_v22 = vpop.permute.xlu1 %1975 }
 0x368   : > { %v2628_v47 = vsel %vm2576_vm1, %v1964_v18, 0  ;;  %v1224_v5 = vcombine.high %v6631_v0, %v6641_v14  ;;  %v1175_v7 = vcombine.low %v1110_v58, %v1126_v31  ;;  %v1176_v49 = vcombine.high %v1110_v58, %v1126_v31  ;;  %5379 = vmatprep.mubr.msk.bf16.mxu1 %vm6059_vm0, %v6057_v4 }
 0x369   : > { %5378 = vmatpush3.bf16.xpose.msra.mxu1 %v2628_v47  ;;  %v6735_v50 = vrot.slane %v5119_v28, %v6501_v10  ;;  %v6738_v52 = vrot.slane %v5121_v29, %v6501_v10  ;;  %v1207_v1 = vcombine.low %v1142_v40, %v1158_v33  ;;  %v1208_v2 = vcombine.high %v1142_v40, %v1158_v33 }
 0x36a   : > { %v1360_v15 = vcombine.high %v6651_v19, %v6654_v20  ;;  %5383 = vmatprep.subr.bf16.mxu1 %v6057_v4  ;;  %v6746_v0 = vrot.slane %v5123_v23, %v6501_v10  ;;  %v6749_v14 = vrot.slane %v5125_v48, %v6501_v10  ;;  %v999_v56 = vrot.slane %v991_v24, %v6501_v10  ;;  %v2004_v29 = vpop.permute.xlu0 %2003 }
 0x36b   : > { %v1006_v18 = vrot.slane %v992_v39, %v6501_v10  ;;  %v1770_v19 = vrot.slane %v1756_v41, %v6506_v17  ;;  %v7495_v20 = vcombine.high %v6537_v61, %v6540_v62  ;;  %v1892_v12 = vcombine.high %v6573_v43, %v6576_v44  ;;  %v1980_v43 = vpop.permute.xlu1 %1979 }
 0x36c   : > { %v1368_v32 = vpack.c.bf16 %v1360_v15, %v1224_v5  ;;  %v6766_v24 = vrot.slane %v1175_v7, %v6506_v17  ;;  %v6769_v39 = vrot.slane %v1176_v49, %v6506_v17  ;;  %v1924_v35 = vcombine.high %v6579_v45, %v6582_v46 }
 0x36d   : > { %v1802_v11 = vrot.slane %v7495_v20, %v6506_v17  ;;  %v1007_v59 = vcombine.low %v6600_v3, %v820_v38  ;;  %v6775_v60 = vrot.slane %v1207_v1, %v6506_v17  ;;  %v6778_v61 = vrot.slane %v1208_v2, %v6506_v17 }
 0x36e   : > { %v1906_v62 = vrot.slane %v1892_v12, %v6506_v17  ;;  %v1008_v41 = vcombine.high %v6600_v3, %v820_v38  ;;  %v1938_v36 = vrot.slane %v1924_v35, %v6506_v17  ;;  %v2031_v13 = vcombine.low %v6695_v42, %v6710_v55 }
 0x36f   : > { %v1821_v44 = vcombine.low %v1770_v19, %v1802_v11  ;;  %v1015_v45 = vrot.slane %v1007_v59, %v6501_v10  ;;  %v1225_v30 = vcombine.low %v6634_v8, %v6644_v51  ;;  %v1361_v25 = vcombine.low %v6720_v34, %v6726_v37  ;;  %v1982_v15 = vpop.permute.xlu1 %1981 }
 0x370   : > { %5380 = vmatmul.mubr.msk.bf16.vlgmr.msra.gmra.mrb[8].mxu1 %vm2576_vm1, %v1368_v32  ;;  %v1022_v46 = vrot.slane %v1008_v41, %v6501_v10  ;;  %v1822_v3 = vcombine.high %v1770_v19, %v1802_v11  ;;  %v1957_v38 = vcombine.low %v1906_v62, %v1938_v36  ;;  %v1958_v28 = vcombine.high %v1906_v62, %v1938_v36 }
 0x371   : > { %v1055_v63 = vcombine.low %v999_v56, %v1015_v45  ;;  %v1056_v16 = vcombine.high %v999_v56, %v1015_v45  ;;  %5385 = vmatprep.mubr.msk.bf16.mxu1 %vm6059_vm0, %v6057_v4  ;;  %v2032_v23 = vcombine.high %v6695_v42, %v6710_v55  ;;  %v1369_v31 = vpack.c.bf16 %v1361_v25, %v1225_v30 }
 0x372   : > { %v1071_v48 = vcombine.low %v1006_v18, %v1022_v46  ;;  %v1072_v58 = vcombine.high %v1006_v18, %v1022_v46  ;;  %v1965_v40 = vpack.c.bf16 %v1957_v38, %v1821_v44  ;;  %v1966_v5 = vpack.c.bf16 %v1958_v28, %v1822_v3 }
 0x373   : > { %v1063_v33 = vrot.slane %v1055_v63, %v6506_v17  ;;  %v1070_v47 = vrot.slane %v1056_v16, %v6506_v17  ;;  %v2039_v7 = vrot.slane %v2031_v13, %v6501_v10  ;;  %v2047_v2 = vcombine.low %v6753_v9, %v2004_v29 }
 0x374   : > { %v1079_v49 = vrot.slane %v1071_v48, %v6506_v17  ;;  %v1086_v1 = vrot.slane %v1072_v58, %v6506_v17  ;;  %v2675_v42 = vsel %vm2576_vm1, %v1965_v40, 0  ;;  %v2048_v18 = vcombine.high %v6753_v9, %v2004_v29 }
 0x375   : > { %v5103_v55 = vcombine.low %v1063_v33, %v1070_v47  ;;  %v5105_v56 = vcombine.high %v1063_v33, %v1070_v47  ;;  %5384 = vmatpush3.bf16.xpose.msra.mxu1 %v2675_v42  ;;  %v2015_v20 = vcombine.low %v6403_v54, %v1980_v43  ;;  %v2016_v11 = vcombine.high %v6403_v54, %v1980_v43 }
 0x376   : > { %v5107_v32 = vcombine.low %v1079_v49, %v1086_v1  ;;  %v5109_v19 = vcombine.high %v1079_v49, %v1086_v1  ;;  %5389 = vmatprep.subr.bf16.mxu1 %v6057_v4  ;;  %v2151_v59 = vcombine.low %v6409_v57, %v1982_v15  ;;  %v2152_v62 = vcombine.high %v6409_v57, %v1982_v15  ;;  %v1988_v1 = vpop.permute.xlu1 %1987 }
 0x377   : > { %v1246_v12 = vrot.slane %v5103_v55, %v6501_v10  ;;  %v1262_v35 = vrot.slane %v5105_v56, %v6501_v10  ;;  %v2023_v44 = vrot.slane %v2015_v20, %v6501_v10  ;;  %v2030_v36 = vrot.slane %v2016_v11, %v6501_v10 }
 0x378   : > { %v1278_v41 = vrot.slane %v5107_v32, %v6501_v10  ;;  %v1294_v9 = vrot.slane %v5109_v19, %v6501_v10  ;;  %v2046_v54 = vrot.slane %v2032_v23, %v6501_v10  ;;  %v2722_v43 = vsel %vm2576_vm1, %v1966_v5, 0 }
 0x379   : > { %v6818_v13 = vrot.slane %v2047_v2, %v6501_v10  ;;  %v6821_v45 = vrot.slane %v2048_v18, %v6501_v10  ;;  %v1311_v46 = vcombine.low %v1246_v12, %v1262_v35  ;;  %v1312_v30 = vcombine.high %v1246_v12, %v1262_v35 }
 0x37a   : > { %v2079_v25 = vcombine.low %v2023_v44, %v2039_v7  ;;  %v2080_v3 = vcombine.high %v2023_v44, %v2039_v7  ;;  %v2095_v38 = vcombine.low %v2030_v36, %v2046_v54  ;;  %v2096_v63 = vcombine.high %v2030_v36, %v2046_v54 }
 0x37b   : > { %v2159_v16 = vrot.slane %v2151_v59, %v6501_v10  ;;  %v2166_v28 = vrot.slane %v2152_v62, %v6501_v10  ;;  %v1343_v29 = vcombine.low %v1278_v41, %v1294_v9  ;;  %v1344_v23 = vcombine.high %v1278_v41, %v1294_v9 }
 0x37c   : > { %v2087_v48 = vrot.slane %v2079_v25, %v6506_v17  ;;  %v2094_v58 = vrot.slane %v2080_v3, %v6506_v17  ;;  %5386 = vmatmul.mubr.msk.bf16.vlgmr.msra.gmra.mrb[12].mxu1 %vm2576_vm1, %v1369_v31  ;;  %v6829_v40 = vrot.slane %v2095_v38, %v6506_v17  ;;  %v6832_v33 = vrot.slane %v2096_v63, %v6506_v17 }
 0x37d   : > { %v1226_v47 = vcombine.high %v6634_v8, %v6644_v51  ;;  %v1362_v5 = vcombine.high %v6720_v34, %v6726_v37  ;;  %v6839_v7 = vrot.slane %v1311_v46, %v6506_v17  ;;  %5390 = vmatpush3.bf16.xpose.msra.mxu1 %v2722_v43  ;;  %5391 = vmatprep.mubr.msk.bf16.mxu1 %vm6059_vm0, %v6057_v4  ;;  %v6882_v46 = vpop.permute.xlu1 %1993 }
 0x37e   : > { %v5126_v49 = vcombine.low %v2087_v48, %v2094_v58  ;;  %v1771_v31 = vcombine.low %v6657_v21, %v6660_v53  ;;  %v5128_v2 = vcombine.high %v2087_v48, %v2094_v58  ;;  %v5130_v15 = vcombine.low %v6829_v40, %v6832_v33  ;;  %5401 = vmatprep.subr.bf16.mxu1 %v6057_v4 }
 0x37f   : > { %v1370_v8 = vpack.c.bf16 %v1362_v5, %v1226_v47  ;;  %v1803_v51 = vcombine.low %v6675_v26, %v6678_v27  ;;  %v6851_v34 = vrot.slane %v1312_v30, %v6506_v17  ;;  %v1351_v37 = vrot.slane %v1343_v29, %v6506_v17 }
 0x380   : > { %v1779_v42 = vrot.slane %v1771_v31, %v6506_v17  ;;  %v1907_v55 = vcombine.low %v6735_v50, %v6738_v52  ;;  %v6858_v56 = vrot.slane %v1344_v23, %v6506_v17  ;;  %v5132_v18 = vcombine.high %v6829_v40, %v6832_v33 }
 0x381   : > { %v1811_v32 = vrot.slane %v1803_v51, %v6506_v17  ;;  %v1939_v19 = vcombine.low %v6746_v0, %v6749_v14  ;;  %v6866_v20 = vrot.slane %v5126_v49, %v6501_v10  ;;  %v2167_v12 = vcombine.low %v6732_v22, %v1988_v1 }
 0x382   : > { %v1915_v11 = vrot.slane %v1907_v55, %v6506_v17  ;;  %v2168_v35 = vcombine.high %v6732_v22, %v1988_v1  ;;  %v6872_v59 = vrot.slane %v5128_v2, %v6501_v10  ;;  %v6875_v62 = vrot.slane %v5130_v15, %v6501_v10  ;;  %v1998_v1 = vpop.permute.xlu1 %1997 }
 0x383   : > { %v1947_v41 = vrot.slane %v1939_v19, %v6506_v17  ;;  %v1227_v9 = vcombine.low %v6766_v24, %v6775_v60  ;;  %v1823_v44 = vcombine.low %v1779_v42, %v1811_v32  ;;  %v1824_v36 = vcombine.high %v1779_v42, %v1811_v32 }
 0x384   : > { %v2175_v54 = vrot.slane %v2167_v12, %v6501_v10  ;;  %v2182_v43 = vrot.slane %v2168_v35, %v6501_v10  ;;  %5392 = vmatmul.mubr.msk.bf16.vlgmr.msra.gmra.mrb[16].mxu1 %vm2576_vm1, %v1370_v8  ;;  %v1363_v25 = vcombine.low %v6839_v7, %v1351_v37  ;;  %v1228_v3 = vcombine.high %v6766_v24, %v6775_v60 }
 0x385   : > { %v1959_v22 = vcombine.low %v1915_v11, %v1947_v41  ;;  %v1960_v30 = vcombine.high %v1915_v11, %v1947_v41  ;;  %5403 = vmatprep.mubr.msk.bf16.mxu1 %vm6059_vm0, %v6057_v4  ;;  %v1364_v40 = vcombine.high %v6839_v7, %v1351_v37  ;;  %v1772_v33 = vcombine.high %v6657_v21, %v6660_v53 }
 0x386   : > { %v2215_v38 = vcombine.low %v2159_v16, %v2175_v54  ;;  %v2216_v63 = vcombine.high %v2159_v16, %v2175_v54  ;;  %v2231_v29 = vcombine.low %v2166_v28, %v2182_v43  ;;  %v2232_v23 = vcombine.high %v2166_v28, %v2182_v43 }
 0x387   : > { %v1967_v48 = vpack.c.bf16 %v1959_v22, %v1823_v44  ;;  %v1968_v58 = vpack.c.bf16 %v1960_v30, %v1824_v36  ;;  %v1804_v49 = vcombine.high %v6675_v26, %v6678_v27  ;;  %v1908_v7 = vcombine.high %v6735_v50, %v6738_v52  ;;  %v2010_v27 = vpop.permute.xlu0 %2009 }
 0x388   : > { %v2223_v47 = vrot.slane %v2215_v38, %v6506_v17  ;;  %v2230_v5 = vrot.slane %v2216_v63, %v6506_v17  ;;  %v2239_v24 = vrot.slane %v2231_v29, %v6506_v17  ;;  %v2246_v60 = vrot.slane %v2232_v23, %v6506_v17 }
 0x389   : > { %v2769_v16 = vsel %vm2576_vm1, %v1967_v48, 0  ;;  %v2816_v28 = vsel %vm2576_vm1, %v1968_v58, 0  ;;  %v1786_v15 = vrot.slane %v1772_v33, %v6506_v17  ;;  %v1818_v8 = vrot.slane %v1804_v49, %v6506_v17 }
 0x38a   : > { %5396 = vmatpush3.bf16.xpose.msra.mxu0 %v2769_v16  ;;  %5402 = vmatpush3.bf16.xpose.msra.mxu1 %v2816_v28  ;;  %v5134_v21 = vcombine.low %v2223_v47, %v2230_v5  ;;  %v5136_v53 = vcombine.high %v2223_v47, %v2230_v5  ;;  %v5138_v31 = vcombine.low %v2239_v24, %v2246_v60 }
 0x38b   : > { %v5140_v2 = vcombine.high %v2239_v24, %v2246_v60  ;;  %5407 = vmatprep.subr.bf16.mxu0 %v6057_v4  ;;  %5413 = vmatprep.subr.bf16.mxu1 %v6057_v4  ;;  %v6908_v26 = vrot.slane %v5132_v18, %v6501_v10  ;;  %v1371_v50 = vpack.c.bf16 %v1363_v25, %v1227_v9 }
 0x38c   : > { %v1922_v52 = vrot.slane %v1908_v7, %v6506_v17  ;;  %v1940_v51 = vcombine.high %v6746_v0, %v6749_v14  ;;  %v6914_v37 = vrot.slane %v5134_v21, %v6501_v10  ;;  %v6917_v42 = vrot.slane %v5136_v53, %v6501_v10 }
 0x38d   : > { %v1372_v55 = vpack.c.bf16 %v1364_v40, %v1228_v3  ;;  %v2063_v32 = vcombine.low %v1998_v1, %v2010_v27  ;;  %v6920_v19 = vrot.slane %v5138_v31, %v6501_v10  ;;  %v6923_v18 = vrot.slane %v5140_v2, %v6501_v10 }
 0x38e   : > { %v1954_v11 = vrot.slane %v1940_v51, %v6506_v17  ;;  %v2064_v12 = vcombine.high %v1998_v1, %v2010_v27  ;;  %v1825_v35 = vcombine.low %v1786_v15, %v1818_v8  ;;  %v1826_v41 = vcombine.high %v1786_v15, %v1818_v8 }
 0x38f   : > { %v2071_v0 = vrot.slane %v2063_v32, %v6501_v10  ;;  %v1365_v14 = vcombine.low %v6851_v34, %v6858_v56  ;;  %v1229_v54 = vcombine.low %v6769_v39, %v6778_v61  ;;  %v1366_v30 = vcombine.high %v6851_v34, %v6858_v56 }
 0x390   : > { %v1961_v9 = vcombine.low %v1922_v52, %v1954_v11  ;;  %v1962_v44 = vcombine.high %v1922_v52, %v1954_v11  ;;  %v2078_v36 = vrot.slane %v2064_v12, %v6501_v10  ;;  %v1230_v34 = vcombine.high %v6769_v39, %v6778_v61 }
 0x391   : > { %5398 = vmatmul.mubr.msk.bf16.vlgmr.msra.gmra.mrb[4].mxu0 %vm2576_vm1, %v1371_v50  ;;  %5404 = vmatmul.mubr.msk.bf16.vlgmr.msra.gmra.mrb[20].mxu1 %vm2576_vm1, %v1372_v55  ;;  %v2111_v43 = vcombine.low %v6818_v13, %v2071_v0  ;;  %v2112_v22 = vcombine.high %v6818_v13, %v2071_v0  ;;  %v1373_v13 = vpack.c.bf16 %v1365_v14, %v1229_v54 }
 0x392   : > { %v1969_v25 = vpack.c.bf16 %v1961_v9, %v1825_v35  ;;  %v1970_v3 = vpack.c.bf16 %v1962_v44, %v1826_v41  ;;  %v2127_v38 = vcombine.low %v6821_v45, %v2078_v36  ;;  %v2128_v63 = vcombine.high %v6821_v45, %v2078_v36  ;;  %5409 = vmatprep.mubr.msk.bf16.mxu0 %vm6059_vm0, %v6057_v4 }
 0x393   : > { %v2119_v29 = vrot.slane %v2111_v43, %v6506_v17  ;;  %v2126_v23 = vrot.slane %v2112_v22, %v6506_v17  ;;  %5415 = vmatprep.mubr.msk.bf16.mxu1 %vm6059_vm0, %v6057_v4  ;;  %v1374_v47 = vpack.c.bf16 %v1366_v30, %v1230_v34  ;;  %v2351_v39 = vcombine.low %v6866_v20, %v6872_v59 }
 0x394   : > { %v2863_v56 = vsel %vm2576_vm1, %v1969_v25, 0  ;;  %v2910_v48 = vsel %vm2576_vm1, %v1970_v3, 0  ;;  %v2135_v45 = vrot.slane %v2127_v38, %v6506_v17  ;;  %v2142_v58 = vrot.slane %v2128_v63, %v6506_v17 }
 0x395   : > { %5408 = vmatpush3.bf16.xpose.msra.mxu0 %v2863_v56  ;;  %5414 = vmatpush3.bf16.xpose.msra.mxu1 %v2910_v48  ;;  %v5127_v40 = vcombine.low %v2119_v29, %v2126_v23  ;;  %v5129_v33 = vcombine.high %v2119_v29, %v2126_v23  ;;  %v2383_v16 = vcombine.low %v6875_v62, %v6908_v26  ;;  %v7496_v63 = vlaneseq }
 0x396   : > { %v5131_v5 = vcombine.low %v2135_v45, %v2142_v58  ;;  %v5133_v24 = vcombine.high %v2135_v45, %v2142_v58  ;;  %5419 = vmatprep.subr.bf16.mxu0 %v6057_v4  ;;  %5425 = vmatprep.subr.bf16.mxu1 %v6057_v4  ;;  %v2487_v28 = vcombine.low %v6914_v37, %v6917_v42  ;;  %v2569_v23 = vadd.s32 8, %v6496_v6 }
 0x397   : > { %v2302_v61 = vrot.slane %v5127_v40, %v6501_v10  ;;  %v2318_v60 = vrot.slane %v5129_v33, %v6501_v10  ;;  %v2359_v21 = vrot.slane %v2351_v39, %v6506_v17  ;;  %v2519_v53 = vcombine.low %v6920_v19, %v6923_v18 }
 0x398   : > { %v2334_v49 = vrot.slane %v5131_v5, %v6501_v10  ;;  %v2350_v7 = vrot.slane %v5133_v24, %v6501_v10  ;;  %v2391_v31 = vrot.slane %v2383_v16, %v6506_v17  ;;  %v2495_v1 = vrot.slane %v2487_v28, %v6506_v17 }
 0x399   : > { %v2352_v2 = vcombine.high %v6866_v20, %v6872_v59  ;;  %v2384_v15 = vcombine.high %v6875_v62, %v6908_v26  ;;  %v2527_v8 = vrot.slane %v2519_v53, %v6506_v17  ;;  %v2488_v27 = vcombine.high %v6914_v37, %v6917_v42 }
 0x39a   : > { %v2520_v50 = vcombine.high %v6920_v19, %v6923_v18  ;;  %v2367_v52 = vcombine.low %v2302_v61, %v2318_v60  ;;  %v2415_v51 = vcombine.low %v2359_v21, %v2391_v31  ;;  %v2416_v55 = vcombine.high %v2359_v21, %v2391_v31 }
 0x39b   : > { %v2366_v32 = vrot.slane %v2352_v2, %v6506_v17  ;;  %v2398_v11 = vrot.slane %v2384_v15, %v6506_v17  ;;  %v2551_v20 = vcombine.low %v2495_v1, %v2527_v8  ;;  %v2552_v59 = vcombine.high %v2495_v1, %v2527_v8 }
 0x39c   : > { %5410 = vmatmul.mubr.msk.bf16.vlgmr.msra.gmra.mrb[8].mxu0 %vm2576_vm1, %v1373_v13  ;;  %5416 = vmatmul.mubr.msk.bf16.vlgmr.msra.gmra.mrb[24].mxu1 %vm2576_vm1, %v1374_v47  ;;  %v2502_v62 = vrot.slane %v2488_v27, %v6506_v17  ;;  %v2534_v37 = vrot.slane %v2520_v50, %v6506_v17  ;;  %v6989_v12 = vrot.slane %v2367_v52, %v6506_v17  ;;  %v2571_v29 = vand.u32 127, %v7496_v63 }
 0x39d   : > { %5421 = vmatprep.mubr.msk.bf16.mxu0 %vm6059_vm0, %v6057_v4  ;;  %v2417_v26 = vcombine.low %v2366_v32, %v2398_v11  ;;  %5427 = vmatprep.mubr.msk.bf16.mxu1 %vm6059_vm0, %v6057_v4  ;;  %v2418_v42 = vcombine.high %v2366_v32, %v2398_v11  ;;  %v2559_v19 = vpack.c.bf16 %v2551_v20, %v2415_v51  ;;  %v6069_v13 = vmov -1e+30  }
 0x39e   : > { %v2560_v18 = vpack.c.bf16 %v2552_v59, %v2416_v55  ;;  %v2399_v35 = vcombine.low %v2334_v49, %v2350_v7  ;;  %v2553_v41 = vcombine.low %v2502_v62, %v2534_v37  ;;  %v2554_v0 = vcombine.high %v2502_v62, %v2534_v37 }
 0x39f   : > { %v2368_v14 = vcombine.high %v2302_v61, %v2318_v60  ;;  %v2400_v9 = vcombine.high %v2334_v49, %v2350_v7  ;;  %5420 = vmatpush3.bf16.msra.mxu0 %v2559_v19  ;;  %vm2572_vm2 = vcmp.ge.s32.totalorder %v6496_v6, %v2571_v29  ;;  %vm2573_vm3 = vcmp.ge.s32.totalorder %v2569_v23, %v2571_v29 }
 0x3a0   : > { %5426 = vmatpush3.bf16.msra.mxu1 %v2560_v18  ;;  %v6992_v44 = vrot.slane %v2399_v35, %v6506_v17  ;;  %5431 = vmatprep.subr.bf16.mxu0 %v6057_v4  ;;  %v6995_v36 = vpack.c.bf16 %v2553_v41, %v2417_v26  ;;  %v6998_v54 = vpack.c.bf16 %v2554_v0, %v2418_v42  ;;  %v7017_v34 = vsel %vm2572_vm2, 0.0, %v6069_v13 }
 0x3a1   : > { %5437 = vmatprep.subr.bf16.mxu1 %v6057_v4  ;;  %v7001_v43 = vrot.slane %v2368_v14, %v6506_v17  ;;  %v7008_v25 = vrot.slane %v2400_v9, %v6506_v17  ;;  %v7019_v48 = vsel %vm2573_vm3, 0.0, %v6069_v13 }
 0x3a2   : > { %v2419_v22 = vcombine.low %v6989_v12, %v6992_v44  ;;  %v2420_v30 = vcombine.high %v6989_v12, %v6992_v44 }
 0x3a3   : > { %v2421_v3 = vcombine.low %v7001_v43, %v7008_v25  ;;  %v2422_v38 = vcombine.high %v7001_v43, %v7008_v25 }
 0x43a   : > { %v2617_v56 = vpop.f32.mrb[4].mxu1 }
 0x43b   : > { %v7022_v45 = vadd.f32 %v2617_v56, %v7017_v34  ;;  %v5375_v58 = vpop.f32.mrb[5].mxu1 }
 0x43c   : > { %v2620_v40 = vpop.f32.mrb[6].mxu1 }
 0x43d   : > { %v7025_v33 = vadd.f32 %v2620_v40, %v7019_v48  ;;  %v5376_v47 = vpop.f32.mrb[7].mxu1  ;;  %v2953_v5 = vsel %vm2576_vm1, %v7022_v45, -inf }
 0x43e   : > { %2954 = vmax.xlane.f32.xlu0 %v2953_v5 }
 0x43f   : > { %v2956_v24 = vsel %vm2576_vm1, %v7025_v33, -inf }
 0x440   : > { %2957 = vmax.xlane.f32.xlu1 %v2956_v24 }
 0x443   : > { %v2664_v39 = vpop.f32.mrb[8].mxu1 }
 0x444   : > { %v5381_v61 = vpop.f32.mrb[9].mxu1  ;;  %v7038_v11 = vadd.f32 %v2664_v39, %v7017_v34 }
 0x445   : > { %v2667_v60 = vpop.f32.mrb[10].mxu1 }
 0x446   : > { %v5382_v16 = vpop.f32.mrb[11].mxu1  ;;  %v7051_v19 = vadd.f32 %v2667_v60, %v7019_v48  ;;  %v2959_v18 = vsel %vm2576_vm1, %v7038_v11, -inf }
 0x448   : > { %v2962_v63 = vsel %vm2576_vm1, %v7051_v19, -inf }
 0x44f   : > { %v2711_v28 = vpop.f32.mrb[12].mxu1 }
 0x450   : > { %v5387_v49 = vpop.f32.mrb[13].mxu1  ;;  %v7061_v0 = vadd.f32 %v2711_v28, %v7017_v34 }
 0x451   : > { %v2714_v7 = vpop.f32.mrb[14].mxu1 }
 0x452   : > { %v5388_v21 = vpop.f32.mrb[15].mxu1  ;;  %v7046_v37 = vadd.f32 %v2714_v7, %v7019_v48  ;;  %v2965_v16 = vsel %vm2576_vm1, %v7061_v0, -inf }
 0x454   : > { %v2968_v41 = vsel %vm2576_vm1, %v7046_v37, -inf }
 0x457   : > { %v2758_v53 = vpop.f32.mrb[16].mxu1 }
 0x458   : > { %v5393_v31 = vpop.f32.mrb[17].mxu1  ;;  %v7080_v60 = vadd.f32 %v2758_v53, %v7017_v34 }
 0x459   : > { %v2761_v1 = vpop.f32.mrb[18].mxu1 }
 0x45a   : > { %v5394_v2 = vpop.f32.mrb[19].mxu1  ;;  %v7085_v28 = vadd.f32 %v2761_v1, %v7019_v48  ;;  %v2971_v49 = vsel %vm2576_vm1, %v7080_v60, -inf  ;;  %v2000_v1 = vpop.permute.xlu1 %1999 }
 0x45c   : > { %v2974_v7 = vsel %vm2576_vm1, %v7085_v28, -inf }
 0x45e   : > { %v2006_v2 = vpop.permute.xlu1 %2005 }
 0x464   : > { %v2805_v15 = vpop.f32.mrb[4].mxu0  ;;  %v2852_v8 = vpop.f32.mrb[20].mxu1 }
 0x465   : > { %v7032_v27 = vadd.f32 %v2805_v15, %v7017_v34  ;;  %v7035_v50 = vadd.f32 %v2852_v8, %v7017_v34  ;;  %v5399_v52 = vpop.f32.mrb[5].mxu0  ;;  %v5405_v51 = vpop.f32.mrb[21].mxu1 }
 0x466   : > { %v2808_v55 = vpop.f32.mrb[6].mxu0  ;;  %v2855_v32 = vpop.f32.mrb[22].mxu1 }
 0x467   : > { %v7041_v20 = vadd.f32 %v2808_v55, %v7019_v48  ;;  %v5400_v59 = vpop.f32.mrb[7].mxu0  ;;  %v5406_v62 = vpop.f32.mrb[23].mxu1  ;;  %v2977_v26 = vsel %vm2576_vm1, %v7032_v27, -inf  ;;  %v7056_v35 = vadd.f32 %v2855_v32, %v7019_v48  ;;  %v2983_v21 = vsel %vm2576_vm1, %v7035_v50, -inf }
 0x468   : > { %2978 = vmax.xlane.f32.xlu0 %v2977_v26 }
 0x469   : > { %v2980_v42 = vsel %vm2576_vm1, %v7041_v20, -inf  ;;  %v2986_v47 = vsel %vm2576_vm1, %v7056_v35, -inf }
 0x46a   : > { %2981 = vmax.xlane.f32.xlu1 %v2980_v42 }
 0x46c   : > { %2960 = vmax.xlane.f32.xlu0 %v2959_v18 }
 0x46e   : > { %2969 = vmax.xlane.f32.xlu1 %v2968_v41 }
 0x46f   : > { %v2946_v14 = vpop.f32.mrb[24].mxu1  ;;  %v2899_v9 = vpop.f32.mrb[8].mxu0 }
 0x470   : > { %v7066_v29 = vadd.f32 %v2946_v14, %v7017_v34  ;;  %v7069_v23 = vadd.f32 %v2899_v9, %v7017_v34  ;;  %v5411_v13 = vpop.f32.mrb[9].mxu0  ;;  %v5417_v56 = vpop.f32.mrb[25].mxu1  ;;  %2963 = vmax.xlane.f32.xlu0 %v2962_v63 }
 0x471   : > { %v2949_v58 = vpop.f32.mrb[26].mxu1  ;;  %v2902_v40 = vpop.f32.mrb[10].mxu0 }
 0x472   : > { %v7074_v5 = vadd.f32 %v2949_v58, %v7019_v48  ;;  %v7077_v24 = vadd.f32 %v2902_v40, %v7019_v48  ;;  %v5412_v39 = vpop.f32.mrb[11].mxu0  ;;  %v5418_v61 = vpop.f32.mrb[27].mxu1  ;;  %2987 = vmax.xlane.f32.xlu1 %v2986_v47  ;;  %v2989_v34 = vsel %vm2576_vm1, %v7069_v23, -inf  ;;  %v2995_v48 = vsel %vm2576_vm1, %v7066_v29, -inf }
 0x473   : > { %v2183_v61 = vcombine.low %v6882_v46, %v2006_v2 }
 0x474   : > { %2966 = vmax.xlane.f32.xlu0 %v2965_v16  ;;  %v2998_v53 = vsel %vm2576_vm1, %v7074_v5, -inf  ;;  %v2992_v31 = vsel %vm2576_vm1, %v7077_v24, -inf }
 0x478   : > { %2972 = vmax.xlane.f32.xlu0 %v2971_v49 }
 0x47c   : > { %2975 = vmax.xlane.f32.xlu0 %v2974_v7 }
 0x480   : > { %2984 = vmax.xlane.f32.xlu0 %v2983_v21 }
 0x483   : > { %2011 = vrot.lane.b32.xlu1 %v6409_v57, %s6066_s14 }
 0x484   : > { %2990 = vmax.xlane.f32.xlu0 %v2989_v34 }
 0x488   : > { %2996 = vmax.xlane.f32.xlu0 %v2995_v48 }
 0x48c   : > { %2999 = vmax.xlane.f32.xlu0 %v2998_v53 }
 0x4a7   : > { %2993 = vmax.xlane.f32.xlu1 %v2992_v31 }
 0x4cb   : > { %v2955_v15 = vpop.xlane.xlu0 %2954 }
 0x4cc   : > { %v3001_v57 = vsub.f32 %v7022_v45, %v2955_v15 }
 0x4cd   : > { %v2958_v8 = vpop.xlane.xlu1 %2957 }
 0x4ce   : > { %v3017_v52 = vmul.f32 1.442695, %v3001_v57  ;;  %v3002_v51 = vsub.f32 %v7025_v33, %v2958_v8 }
 0x4d0   : > { %5756 = vpow2.f32 %v3017_v52  ;;  %v3019_v55 = vmul.f32 1.442695, %v3002_v51 }
 0x4d2   : > { %5758 = vpow2.f32 %v3019_v55 }
 0x4da   : > { %v5757_v32 = vpop.eup %5756 }
 0x4db   : > { %v3049_v59 = vsel %vm2576_vm1, %v5757_v32, 0.0 }
 0x4dc   : > { %v5759_v62 = vpop.eup %5758  ;;  %3050 = vadd.xlane.f32.xlu0 %v3049_v59 }
 0x4dd   : > { %v3052_v26 = vsel %vm2576_vm1, %v5759_v62, 0.0  ;;  %v3097_v42 = vpack.c.bf16 %v5759_v62, %v5757_v32 }
 0x4de   : > { %3053 = vadd.xlane.f32.xlu1 %v3052_v26 }
 0x4df   : > { %5422 = vmatmul.mubr.msk.bf16.vlgmr.msra.gmra.mrb[12].mxu0 %vm2576_vm1, %v3097_v42 }
 0x4e0   : > { %5432 = vmatpush3.bf16.msra.mxu0 %v6995_v36  ;;  %5433 = vmatprep.mubr.msk.bf16.mxu0 %vm6059_vm0, %v6057_v4 }
 0x4e1   : > { %5443 = vmatprep.subr.bf16.mxu0 %v6057_v4 }
 0x4f5   : > { %v2979_v45 = vpop.xlane.xlu0 %2978 }
 0x4f6   : > { %v3009_v33 = vsub.f32 %v7032_v27, %v2979_v45 }
 0x4f7   : > { %v2982_v18 = vpop.xlane.xlu1 %2981 }
 0x4f8   : > { %v3033_v41 = vmul.f32 1.442695, %v3009_v33  ;;  %v3010_v14 = vsub.f32 %v7041_v20, %v2982_v18  ;;  %v2184_v20 = vcombine.high %v6882_v46, %v2006_v2 }
 0x4f9   : > { %v2961_v9 = vpop.xlane.xlu0 %2960 }
 0x4fa   : > { %5760 = vpow2.f32 %v3033_v41  ;;  %v3035_v63 = vmul.f32 1.442695, %v3010_v14  ;;  %v3003_v13 = vsub.f32 %v7038_v11, %v2961_v9  ;;  %v2198_v53 = vrot.slane %v2184_v20, %v6501_v10 }
 0x4fb   : > { %v2970_v56 = vpop.xlane.xlu1 %2969 }
 0x4fc   : > { %5762 = vpow2.f32 %v3035_v63  ;;  %v3021_v36 = vmul.f32 1.442695, %v3003_v13  ;;  %v3006_v58 = vsub.f32 %v7046_v37, %v2970_v56 }
 0x4fd   : > { %v2964_v40 = vpop.xlane.xlu0 %2963 }
 0x4fe   : > { %5764 = vpow2.f32 %v3021_v36  ;;  %v3004_v47 = vsub.f32 %v7051_v19, %v2964_v40  ;;  %v3027_v16 = vmul.f32 1.442695, %v3006_v58  ;;  %v2191_v19 = vrot.slane %v2183_v61, %v6501_v10 }
 0x4ff   : > { %v7117_v39 = vpop.xlane.xlu1 %2987 }
 0x500   : > { %v3023_v27 = vmul.f32 1.442695, %v3004_v47 }
 0x501   : > { %v2967_v49 = vpop.xlane.xlu0 %2966 }
 0x502   : > { %5766 = vpow2.f32 %v3023_v27  ;;  %v3005_v11 = vsub.f32 %v7061_v0, %v2967_v49 }
 0x503   : > { %v2012_v7 = vpop.permute.xlu1 %2011  ;;  %5768 = vpow2.f32 %v3027_v16  ;;  %v3012_v16 = vsub.f32 %v7056_v35, %v7117_v39 }
 0x504   : > { %v7122_v21 = vpop.eup %5760  ;;  %v3025_v37 = vmul.f32 1.442695, %v3005_v11  ;;  %v2199_v34 = vcombine.low %v2000_v1, %v2012_v7  ;;  %v2200_v48 = vcombine.high %v2000_v1, %v2012_v7 }
 0x505   : > { %v2973_v31 = vpop.xlane.xlu0 %2972  ;;  %v3073_v46 = vsel %vm2576_vm1, %v7122_v21, 0.0 }
 0x506   : > { %v7128_v2 = vpop.eup %5762  ;;  %5770 = vpow2.f32 %v3025_v37  ;;  %v2207_v0 = vrot.slane %v2199_v34, %v6501_v10  ;;  %v2214_v15 = vrot.slane %v2200_v48, %v6501_v10  ;;  %v3007_v57 = vsub.f32 %v7080_v60, %v2973_v31  ;;  %3074 = vadd.xlane.f32.xlu0 %v3073_v46 }
 0x507   : > { %v3076_v1 = vsel %vm2576_vm1, %v7128_v2, 0.0  ;;  %v3039_v46 = vmul.f32 1.442695, %v3012_v16 }
 0x508   : > { %v5765_v8 = vpop.eup %5764  ;;  %v2247_v52 = vcombine.low %v2191_v19, %v2207_v0  ;;  %v2248_v51 = vcombine.high %v2191_v19, %v2207_v0  ;;  %v2263_v55 = vcombine.low %v2198_v53, %v2214_v15  ;;  %v2264_v32 = vcombine.high %v2198_v53, %v2214_v15  ;;  %3077 = vadd.xlane.f32.xlu1 %v3076_v1 }
 0x509   : > { %v3029_v59 = vmul.f32 1.442695, %v3007_v57  ;;  %v2976_v62 = vpop.xlane.xlu0 %2975  ;;  %v3055_v26 = vsel %vm2576_vm1, %v5765_v8, 0.0 }
 0x50a   : > { %v2255_v42 = vrot.slane %v2247_v52, %v6506_v17  ;;  %v2262_v45 = vrot.slane %v2248_v51, %v6506_v17  ;;  %v2271_v60 = vrot.slane %v2263_v55, %v6506_v17  ;;  %v2278_v33 = vrot.slane %v2264_v32, %v6506_v17  ;;  %3056 = vadd.xlane.f32.xlu0 %v3055_v26 }
 0x50b   : > { %v3008_v18 = vsub.f32 %v7085_v28, %v2976_v62  ;;  %5772 = vpow2.f32 %v3029_v59 }
 0x50c   : > { %v5767_v41 = vpop.eup %5766  ;;  %v5135_v14 = vcombine.low %v2255_v42, %v2262_v45  ;;  %v5137_v9 = vcombine.high %v2255_v42, %v2262_v45  ;;  %v5139_v63 = vcombine.low %v2271_v60, %v2278_v33  ;;  %v5141_v13 = vcombine.high %v2271_v60, %v2278_v33 }
 0x50d   : > { %v3031_v56 = vmul.f32 1.442695, %v3008_v18  ;;  %v2985_v36 = vpop.xlane.xlu0 %2984  ;;  %v3058_v58 = vsel %vm2576_vm1, %v5767_v41, 0.0  ;;  %v3098_v40 = vpack.c.bf16 %v5767_v41, %v5765_v8  ;;  %v7146_v28 = vpop.eup %5768 }
 0x50e   : > { %v2438_v47 = vrot.slane %v5135_v14, %v6501_v10  ;;  %v2454_v27 = vrot.slane %v5137_v9, %v6501_v10  ;;  %v2470_v61 = vrot.slane %v5139_v63, %v6501_v10  ;;  %v2486_v20 = vrot.slane %v5141_v13, %v6501_v10  ;;  %3059 = vadd.xlane.f32.xlu1 %v3058_v58 }
 0x50f   : > { %5774 = vpow2.f32 %v3031_v56  ;;  %v3011_v49 = vsub.f32 %v7035_v50, %v2985_v36  ;;  %5428 = vmatmul.mubr.msk.bf16.vlgmr.msra.gmra.mrb[28].mxu1 %vm2576_vm1, %v3098_v40  ;;  %v7497_v14 = vmov 0  }
 0x510   : > { %v5771_v11 = vpop.eup %5770  ;;  %5438 = vmatpush3.bf16.msra.mxu1 %v6998_v54  ;;  %v2503_v7 = vcombine.low %v2438_v47, %v2454_v27  ;;  %v2535_v37 = vcombine.low %v2470_v61, %v2486_v20  ;;  %5439 = vmatprep.mubr.msk.bf16.mxu1 %vm6059_vm0, %v6057_v4  ;;  %v2504_v34 = vcombine.high %v2438_v47, %v2454_v27  ;;  %v3064_v47 = vsel %vm2576_vm1, %v7146_v28, 0.0 }
 0x511   : > { %v3037_v48 = vmul.f32 1.442695, %v3011_v49  ;;  %v2991_v19 = vpop.xlane.xlu0 %2990  ;;  %v3099_v53 = vpack.c.bf16 %v7146_v28, %v5771_v11  ;;  %5449 = vmatprep.subr.bf16.mxu1 %v6057_v4  ;;  %v2536_v35 = vcombine.high %v2470_v61, %v2486_v20 }
 0x512   : > { %v3013_v50 = vsub.f32 %v7069_v23, %v2991_v19  ;;  %v2511_v39 = vrot.slane %v2503_v7, %v6506_v17  ;;  %v2543_v31 = vrot.slane %v2535_v37, %v6506_v17  ;;  %v2518_v54 = vrot.slane %v2504_v34, %v6506_v17 }
 0x513   : > { %5434 = vmatmul.mubr.msk.bf16.vlgmr.msra.gmra.mrb[16].mxu0 %vm2576_vm1, %v3099_v53  ;;  %v2550_v0 = vrot.slane %v2536_v35, %v6506_v17  ;;  %5776 = vpow2.f32 %v3037_v48 }
 0x514   : > { %v3041_v15 = vmul.f32 1.442695, %v3013_v50  ;;  %v2555_v57 = vcombine.low %v2511_v39, %v2543_v31  ;;  %5445 = vmatprep.mubr.msk.bf16.mxu0 %vm6059_vm0, %v6057_v4  ;;  %v2556_v1 = vcombine.high %v2511_v39, %v2543_v31 }
 0x515   : > { %v2997_v8 = vpop.xlane.xlu0 %2996  ;;  %v2557_v23 = vcombine.low %v2518_v54, %v2550_v0  ;;  %v2558_v52 = vcombine.high %v2518_v54, %v2550_v0  ;;  %v5773_v59 = vpop.eup %5772 }
 0x516   : > { %5778 = vpow2.f32 %v3041_v15  ;;  %v3015_v51 = vsub.f32 %v7066_v29, %v2997_v8  ;;  %v2563_v55 = vpack.c.bf16 %v2555_v57, %v2419_v22  ;;  %v2564_v32 = vpack.c.bf16 %v2556_v1, %v2420_v30 }
 0x517   : > { %5780 = vpow2.f32 %v3039_v46  ;;  %v2565_v62 = vpack.c.bf16 %v2557_v23, %v2421_v3  ;;  %v2566_v26 = vpack.c.bf16 %v2558_v52, %v2422_v38  ;;  %v3101_v22 = vpack.c.bf16 %v7128_v2, %v7122_v21 }
 0x518   : > { %5444 = vmatpush3.bf16.msra.mxu0 %v2563_v55  ;;  %v3045_v42 = vmul.f32 1.442695, %v3015_v51  ;;  %v3061_v21 = vsel %vm2576_vm1, %v5771_v11, 0.0  ;;  %v3067_v33 = vsel %vm2576_vm1, %v5773_v59, 0.0 }
 0x519   : > { %v5775_v29 = vpop.eup %5774  ;;  %v3000_v45 = vpop.xlane.xlu0 %2999  ;;  %5455 = vmatprep.subr.bf16.mxu0 %v6057_v4 }
 0x51a   : > { %v3016_v12 = vsub.f32 %v7074_v5, %v3000_v45  ;;  %v3100_v44 = vpack.c.bf16 %v5775_v29, %v5773_v59  ;;  %5782 = vpow2.f32 %v3045_v42  ;;  %v3070_v27 = vsel %vm2576_vm1, %v5775_v29, 0.0 }
 0x51b   : > { %5446 = vmatmul.mubr.msk.bf16.vlgmr.msra.gmra.mrb[20].mxu0 %vm2576_vm1, %v3101_v22 }
 0x51c   : > { %v3047_v30 = vmul.f32 1.442695, %v3016_v12  ;;  %5440 = vmatmul.mubr.msk.bf16.vlgmr.msra.gmra.mrb[32].mxu1 %vm2576_vm1, %v3100_v44  ;;  %5456 = vmatpush3.bf16.msra.mxu0 %v2565_v62 }
 0x51d   : > { %5450 = vmatpush3.bf16.msra.mxu1 %v2564_v32  ;;  %5451 = vmatprep.mubr.msk.bf16.mxu1 %vm6059_vm0, %v6057_v4  ;;  %v5777_v43 = vpop.eup %5776 }
 0x51e   : > { %5784 = vpow2.f32 %v3047_v30  ;;  %5461 = vmatprep.subr.bf16.mxu1 %v6057_v4  ;;  %5457 = vmatprep.mubr.msk.bf16.mxu0 %vm6059_vm0, %v6057_v4  ;;  %v3079_v41 = vsel %vm2576_vm1, %v5777_v43, 0.0 }
 0x51f   : > { %5467 = vmatprep.subr.bf16.mxu0 %v6057_v4 }
 0x520   : > { %v5779_v25 = vpop.eup %5778 }
 0x521   : > { %v5781_v3 = vpop.eup %5780  ;;  %v3085_v38 = vsel %vm2576_vm1, %v5779_v25, 0.0 }
 0x522   : > { %3086 = vadd.xlane.f32.xlu0 %v3085_v38  ;;  %v3102_v5 = vpack.c.bf16 %v5781_v3, %v5777_v43 }
 0x524   : > { %5452 = vmatmul.mubr.msk.bf16.vlgmr.msra.gmra.mrb[36].mxu1 %vm2576_vm1, %v3102_v5  ;;  %v5783_v2 = vpop.eup %5782 }
 0x525   : > { %5462 = vmatpush3.bf16.msra.mxu1 %v2566_v26  ;;  %5463 = vmatprep.mubr.msk.bf16.mxu1 %vm6059_vm0, %v6057_v4  ;;  %v3091_v9 = vsel %vm2576_vm1, %v5783_v2, 0.0 }
 0x526   : > { %3062 = vadd.xlane.f32.xlu0 %v3061_v21 }
 0x528   : > { %v5785_v60 = vpop.eup %5784 }
 0x529   : > { %v3104_v18 = vpack.c.bf16 %v5785_v60, %v5783_v2  ;;  %v3094_v61 = vsel %vm2576_vm1, %v5785_v60, 0.0 }
 0x52a   : > { %3068 = vadd.xlane.f32.xlu0 %v3067_v33 }
 0x52c   : > { %5464 = vmatmul.mubr.msk.bf16.vlgmr.msra.gmra.mrb[40].mxu1 %vm2576_vm1, %v3104_v18 }
 0x52d   : > { %4511 = vmatprep.mubr.bf16.mxu1 %v7497_v14 }
 0x52e   : > { %3080 = vadd.xlane.f32.xlu0 %v3079_v41 }
 0x532   : > { %3092 = vadd.xlane.f32.xlu0 %v3091_v9 }
 0x534   : > { %v2994_v63 = vpop.xlane.xlu1 %2993 }
 0x535   : > { %v3014_v13 = vsub.f32 %v7077_v24, %v2994_v63  ;;  %v3082_v24 = vsel %vm2576_vm1, %v5781_v3, 0.0 }
 0x537   : > { %v3043_v56 = vmul.f32 1.442695, %v3014_v13 }
 0x539   : > { %5786 = vpow2.f32 %v3043_v56 }
 0x543   : > { %v5787_v36 = vpop.eup %5786 }
 0x544   : > { %v3088_v58 = vsel %vm2576_vm1, %v5787_v36, 0.0  ;;  %v3103_v40 = vpack.c.bf16 %v5787_v36, %v5779_v25 }
 0x545   : > { %3089 = vadd.xlane.f32.xlu1 %v3088_v58 }
 0x546   : > { %5458 = vmatmul.mubr.msk.bf16.vlgmr.msra.gmra.mrb[24].mxu0 %vm2576_vm1, %v3103_v40 }
 0x547   : > { %5483 = vmatprep.mubr.msk.bf16.mxu0 %vm6059_vm0, %v6057_v4 }
 0x549   : > { %3065 = vadd.xlane.f32.xlu1 %v3064_v47 }
 0x54d   : > { %3071 = vadd.xlane.f32.xlu1 %v3070_v27 }
 0x551   : > { %3083 = vadd.xlane.f32.xlu1 %v3082_v24 }
 0x555   : > { %3095 = vadd.xlane.f32.xlu1 %v3094_v61 }
 0x569   : > { %v3051_v7 = vpop.xlane.xlu0 %3050 }
 0x56a   : > { %5788 = vrcp.f32 %v3051_v7 }
 0x56b   : > { %v3054_v37 = vpop.xlane.xlu1 %3053 }
 0x574   : > { %v5789_v57 = vpop.eup %5788 }
 0x593   : > { %v7210_v34 = vpop.xlane.xlu0 %3074 }
 0x595   : > { %v7212_v48 = vpop.xlane.xlu1 %3077 }
 0x597   : > { %v3057_v28 = vpop.xlane.xlu0 %3056 }
 0x59b   : > { %v3060_v19 = vpop.xlane.xlu1 %3059 }
 0x5af   : > { %v7214_v53 = vpop.xlane.xlu0 %3086 }
 0x5b2   : > { %v3142_v20 = vpop.f32.mrb[12].mxu0 }
 0x5b3   : > { %v5423_v16 = vpop.f32.mrb[13].mxu0  ;;  %v3063_v50 = vpop.xlane.xlu0 %3062  ;;  %v3473_v51 = vmul.f32 %v5789_v57, %v3142_v20 }
 0x5b4   : > { %v3145_v49 = vpop.f32.mrb[14].mxu0  ;;  %5790 = vrcp.f32 %v3063_v50 }
 0x5b5   : > { %v5424_v11 = vpop.f32.mrb[15].mxu0  ;;  %5792 = vrcp.f32 %v3054_v37 }
 0x5b7   : > { %v3069_v31 = vpop.xlane.xlu0 %3068 }
 0x5bb   : > { %v3081_v62 = vpop.xlane.xlu0 %3080 }
 0x5be   : > { %v5791_v8 = vpop.eup %5790 }
 0x5bf   : > { %v5793_v52 = vpop.eup %5792  ;;  %v3093_v3 = vpop.xlane.xlu0 %3092 }
 0x5c0   : > { %v3474_v29 = vmul.f32 %v5793_v52, %v3145_v49 }
 0x5d2   : > { %v7216_v35 = vpop.xlane.xlu1 %3089 }
 0x5d6   : > { %v3066_v39 = vpop.xlane.xlu1 %3065 }
 0x5d7   : > { %5794 = vrcp.f32 %v3066_v39 }
 0x5d8   : > { %5796 = vrcp.f32 %v3057_v28 }
 0x5d9   : > { %5798 = vrcp.f32 %v3069_v31 }
 0x5da   : > { %v3072_v0 = vpop.xlane.xlu1 %3071  ;;  %5800 = vrcp.f32 %v3060_v19 }
 0x5db   : > { %5802 = vrcp.f32 %v3072_v0 }
 0x5dc   : > { %5804 = vrcp.f32 %v3081_v62 }
 0x5de   : > { %v3084_v43 = vpop.xlane.xlu1 %3083 }
 0x5df   : > { %5806 = vrcp.f32 %v3084_v43 }
 0x5e0   : > { %5808 = vrcp.f32 %v3093_v3 }
 0x5e1   : > { %v5795_v59 = vpop.eup %5794 }
 0x5e2   : > { %v3186_v54 = vpop.f32.mrb[28].mxu1  ;;  %v5797_v25 = vpop.eup %5796 }
 0x5e3   : > { %v5429_v46 = vpop.f32.mrb[29].mxu1  ;;  %v5799_v5 = vpop.eup %5798  ;;  %v3475_v33 = vmul.f32 %v5797_v25, %v3186_v54 }
 0x5e4   : > { %v3189_v15 = vpop.f32.mrb[30].mxu1  ;;  %v5801_v60 = vpop.eup %5800 }
 0x5e5   : > { %v5430_v1 = vpop.f32.mrb[31].mxu1  ;;  %v5803_v63 = vpop.eup %5802  ;;  %v3476_v58 = vmul.f32 %v5801_v60, %v3189_v15 }
 0x5e6   : > { %v3230_v23 = vpop.f32.mrb[16].mxu0  ;;  %v3096_v36 = vpop.xlane.xlu1 %3095 }
 0x5e7   : > { %v3477_v55 = vmul.f32 %v5791_v8, %v3230_v23  ;;  %v5435_v32 = vpop.f32.mrb[17].mxu0  ;;  %5810 = vrcp.f32 %v3096_v36  ;;  %v5805_v62 = vpop.eup %5804 }
 0x5e8   : > { %v3233_v26 = vpop.f32.mrb[18].mxu0  ;;  %5812 = vrcp.f32 %v7210_v34 }
 0x5e9   : > { %v3489_v42 = vcombine.low %v3473_v51, %v3477_v55  ;;  %v3490_v45 = vcombine.high %v3473_v51, %v3477_v55  ;;  %v3478_v22 = vmul.f32 %v5795_v59, %v3233_v26  ;;  %v5436_v12 = vpop.f32.mrb[19].mxu0  ;;  %5814 = vrcp.f32 %v7214_v53 }
 0x5ea   : > { %v5807_v12 = vpop.eup %5806  ;;  %5816 = vrcp.f32 %v7212_v48 }
 0x5eb   : > { %v3625_v44 = vcombine.low %v3474_v29, %v3478_v22  ;;  %v3626_v30 = vcombine.high %v3474_v29, %v3478_v22  ;;  %v3497_v61 = vrot.slane %v3489_v42, %v6501_v10  ;;  %v3504_v20 = vrot.slane %v3490_v45, %v6501_v10  ;;  %v5809_v60 = vpop.eup %5808 }
 0x5ec   : > { %5818 = vrcp.f32 %v7216_v35 }
 0x5ed   : > { %v3633_v39 = vrot.slane %v3625_v44, %v6501_v10  ;;  %v3640_v31 = vrot.slane %v3626_v30, %v6501_v10 }
 0x5ee   : > { %v7218_v38 = vpop.f32.mrb[20].mxu0 }
 0x5ef   : > { %v3274_v21 = vpop.f32.mrb[32].mxu1  ;;  %v5447_v2 = vpop.f32.mrb[21].mxu0 }
 0x5f0   : > { %v3479_v18 = vmul.f32 %v5799_v5, %v3274_v21  ;;  %v5441_v41 = vpop.f32.mrb[33].mxu1  ;;  %v7220_v9 = vpop.f32.mrb[22].mxu0 }
 0x5f1   : > { %v3277_v13 = vpop.f32.mrb[34].mxu1  ;;  %v5448_v56 = vpop.f32.mrb[23].mxu0 }
 0x5f2   : > { %v3505_v40 = vcombine.low %v3475_v33, %v3479_v18  ;;  %v3506_v47 = vcombine.high %v3475_v33, %v3479_v18  ;;  %v3480_v27 = vmul.f32 %v5803_v63, %v3277_v13  ;;  %v5442_v24 = vpop.f32.mrb[35].mxu1 }
 0x5f4   : > { %v3513_v16 = vrot.slane %v3505_v40, %v6501_v10  ;;  %v3520_v49 = vrot.slane %v3506_v47, %v6501_v10  ;;  %v3641_v11 = vcombine.low %v3476_v58, %v3480_v27  ;;  %v3642_v7 = vcombine.high %v3476_v58, %v3480_v27  ;;  %v5811_v40 = vpop.eup %5810 }
 0x5f6   : > { %v3553_v37 = vcombine.low %v3497_v61, %v3513_v16  ;;  %v3554_v28 = vcombine.high %v3497_v61, %v3513_v16  ;;  %v3569_v19 = vcombine.low %v3504_v20, %v3520_v49  ;;  %v3570_v50 = vcombine.high %v3504_v20, %v3520_v49 }
 0x5f7   : > { %v3649_v54 = vrot.slane %v3641_v11, %v6501_v10  ;;  %v3656_v46 = vrot.slane %v3642_v7, %v6501_v10  ;;  %v3362_v0 = vpop.f32.mrb[36].mxu1 }
 0x5f8   : > { %v3561_v15 = vrot.slane %v3553_v37, %v6506_v17  ;;  %v3568_v57 = vrot.slane %v3554_v28, %v6506_v17  ;;  %v3577_v1 = vrot.slane %v3569_v19, %v6506_v17  ;;  %v3584_v8 = vrot.slane %v3570_v50, %v6506_v17  ;;  %v5453_v23 = vpop.f32.mrb[37].mxu1 }
 0x5f9   : > { %v3689_v52 = vcombine.low %v3633_v39, %v3649_v54  ;;  %v3690_v51 = vcombine.high %v3633_v39, %v3649_v54  ;;  %v3705_v55 = vcombine.low %v3640_v31, %v3656_v46  ;;  %v3706_v32 = vcombine.high %v3640_v31, %v3656_v46  ;;  %v3365_v59 = vpop.f32.mrb[38].mxu1 }
 0x5fa   : > { %v5158_v26 = vcombine.low %v3561_v15, %v3568_v57  ;;  %v5160_v29 = vcombine.high %v3561_v15, %v3568_v57  ;;  %v5162_v42 = vcombine.low %v3577_v1, %v3584_v8  ;;  %v5164_v45 = vcombine.high %v3577_v1, %v3584_v8  ;;  %v5454_v22 = vpop.f32.mrb[39].mxu1 }
 0x5fb   : > { %v3697_v44 = vrot.slane %v3689_v52, %v6506_v17  ;;  %v3704_v30 = vrot.slane %v3690_v51, %v6506_v17  ;;  %v3713_v43 = vrot.slane %v3705_v55, %v6506_v17  ;;  %v3720_v25 = vrot.slane %v3706_v32, %v6506_v17 }
 0x5fc   : > { %v7238_v3 = vmul.f32 %v5805_v62, %v3362_v0  ;;  %v7240_v5 = vmul.f32 %v5807_v12, %v3365_v59  ;;  %v3769_v21 = vrot.slane %v5158_v26, %v6501_v10  ;;  %v3785_v2 = vrot.slane %v5160_v29, %v6501_v10  ;;  %v5664_v26 = vld [vmem:[#allocation7] sm:$0xff]  }
 0x5fd   : > { %v5166_v33 = vcombine.low %v3697_v44, %v3704_v30  ;;  %v5168_v18 = vcombine.high %v3697_v44, %v3704_v30  ;;  %v5170_v41 = vcombine.low %v3713_v43, %v3720_v25  ;;  %v5172_v63 = vcombine.high %v3713_v43, %v3720_v25  ;;  %5468 = vmatpush3.bf16.msra.mxu0 %v5664_v26  ;;  %v5665_v44 = vld [vmem:[#allocation7 + $0x8] sm:$0xff]  }
 0x5fe   : > { %v3801_v13 = vrot.slane %v5162_v42, %v6501_v10  ;;  %v3817_v56 = vrot.slane %v5164_v45, %v6501_v10  ;;  %v3826_v36 = vcombine.high %v3769_v21, %v3785_v2  ;;  %v3825_v58 = vcombine.low %v3769_v21, %v3785_v2  ;;  %5469 = vmatprep.subr.bf16.mxu0 %v6057_v4  ;;  %v5666_v2 = vld [vmem:[#allocation7 + $0x10] sm:$0xff]  }
 0x5ff   : > { %v3450_v47 = vpop.f32.mrb[40].mxu1  ;;  %v3905_v27 = vrot.slane %v5166_v33, %v6501_v10  ;;  %v3921_v24 = vrot.slane %v5168_v18, %v6501_v10  ;;  %v3937_v61 = vrot.slane %v5170_v41, %v6501_v10  ;;  %v3953_v20 = vrot.slane %v5172_v63, %v6501_v10  ;;  %v5667_v33 = vld [vmem:[#allocation7 + $0x18] sm:$0xff]   ;;  %v5668_v18 = vld [vmem:[#allocation7 + $0x20] sm:$0xff]   ;;  %v5669_v41 = vld [vmem:[#allocation7 + $0x28] sm:$0xff]   ;;  %v5813_v63 = vpop.eup %5812 }
 0x600   : > { %v7250_v16 = vmul.f32 %v5809_v60, %v3450_v47  ;;  %v5465_v49 = vpop.f32.mrb[41].mxu1  ;;  %v3840_v11 = vrot.slane %v3826_v36, %v6506_v17  ;;  %v3858_v7 = vcombine.high %v3801_v13, %v3817_v56  ;;  %v7254_v37 = vrot.slane %v3825_v58, %v6506_v17  ;;  %v5815_v34 = vpop.eup %5814 }
 0x601   : > { %v3453_v28 = vpop.f32.mrb[42].mxu1  ;;  %v3962_v19 = vcombine.high %v3905_v27, %v3921_v24  ;;  %v3994_v50 = vcombine.high %v3937_v61, %v3953_v20  ;;  %v3857_v39 = vcombine.low %v3801_v13, %v3817_v56  ;;  %v3961_v31 = vcombine.low %v3905_v27, %v3921_v24  ;;  %5470 = vmatpush3.bf16.msra.mxu0 %v5665_v44  ;;  %v5817_v53 = vpop.eup %5816 }
 0x602   : > { %v3537_v54 = vcombine.low %v7238_v3, %v7250_v16  ;;  %v3538_v46 = vcombine.high %v7238_v3, %v7250_v16  ;;  %v7260_v0 = vmul.f32 %v5811_v40, %v3453_v28  ;;  %v5466_v15 = vpop.f32.mrb[43].mxu1  ;;  %v3872_v57 = vrot.slane %v3858_v7, %v6506_v17  ;;  %5471 = vmatprep.subr.bf16.mxu0 %v6057_v4  ;;  %v5819_v58 = vpop.eup %5818 }
 0x603   : > { %v3976_v1 = vrot.slane %v3962_v19, %v6506_v17  ;;  %v4008_v8 = vrot.slane %v3994_v50, %v6506_v17  ;;  %v7266_v23 = vrot.slane %v3857_v39, %v6506_v17  ;;  %v7277_v29 = vrot.slane %v3961_v31, %v6506_v17 }
 0x604   : > { %v3673_v52 = vcombine.low %v7240_v5, %v7260_v0  ;;  %v3674_v51 = vcombine.high %v7240_v5, %v7260_v0  ;;  %v3891_v55 = vcombine.low %v3840_v11, %v3872_v57  ;;  %v3993_v42 = vcombine.low %v3937_v61, %v3953_v20 }
 0x605   : > { %v4027_v32 = vcombine.low %v3976_v1, %v4008_v8  ;;  %v3889_v59 = vcombine.low %v7254_v37, %v7266_v23  ;;  %v3890_v62 = vcombine.high %v7254_v37, %v7266_v23  ;;  %v3892_v45 = vcombine.high %v3840_v11, %v3872_v57  ;;  %5472 = vmatpush3.bf16.msra.mxu0 %v5666_v2 }
 0x606   : > { %v4028_v12 = vcombine.high %v3976_v1, %v4008_v8  ;;  %v7280_v30 = vrot.slane %v3993_v42, %v6506_v17  ;;  %5473 = vmatprep.subr.bf16.mxu0 %v6057_v4  ;;  %v3481_v56 = vmul.f32 %v5813_v63, %v7218_v38  ;;  %v3482_v35 = vmul.f32 %v5817_v53, %v7220_v9  ;;  %v5670_v53 = vld [vmem:[#allocation7 + $0x30] sm:$0xff]  }
 0x607   : > { %v5602_v22 = vpack.i.bf16 %v4027_v32, %v3891_v55  ;;  %v3545_v20 = vrot.slane %v3537_v54, %v6501_v10  ;;  %v3552_v38 = vrot.slane %v3538_v46, %v6501_v10  ;;  %v3681_v31 = vrot.slane %v3673_v52, %v6501_v10 }
 0x608   : > { %v5607_v43 = vpack.i.bf16 %v4028_v12, %v3892_v45  ;;  %v4026_v25 = vcombine.high %v7277_v29, %v7280_v30  ;;  %v4025_v21 = vcombine.low %v7277_v29, %v7280_v30  ;;  %v3688_v3 = vrot.slane %v3674_v51, %v6501_v10 }
 0x609   : > { %5603 = vrot.lane.b32.xlu1 %v5602_v22, %s6065_s12  ;;  %5474 = vmatpush3.bf16.msra.mxu0 %v5667_v33  ;;  %s7499_s12 = sld [smem:[#allocation20_spill]] }
 0x60a   : > { %v5597_v60 = vpack.i.bf16 %v4026_v25, %v3890_v62  ;;  %5475 = vmatprep.subr.bf16.mxu0 %v6057_v4 }
 0x60c   : > { %5598 = vrot.lane.b32.xlu0 %v5597_v60, %s6066_s14  ;;  %s489_s14 = scalar_lea.vmem [#allocation11], %s5062_s11  ;;  %s4927_s11 = scalar_lea.sflag [#allocation4], %s6346_s15 }
 0x60d   : > { %5608 = vrot.lane.b32.xlu1 %v5607_v43, %s6064_s21  ;;  %5476 = vmatpush3.bf16.msra.mxu0 %v5668_v18  ;;  %s4940_s9 = sshll.u32 %s489_s14, 4  ;;  %s7402_s9 = int_to_ptr.vmem [resolvable:$true] %s4940_s9 }
 0x60e   : > { %5477 = vmatprep.subr.bf16.mxu0 %v6057_v4 }
 0x611   : > { %5478 = vmatpush3.bf16.msra.mxu0 %v5669_v41 }
 0x612   : > { %5479 = vmatprep.subr.bf16.mxu0 %v6057_v4 }
 0x615   : > { %5480 = vmatpush3.bf16.msra.mxu0 %v5670_v53 }
 0x616   : > { %5481 = vmatprep.subr.bf16.mxu0 %v6057_v4 }
 0x619   : > { %v3406_v13 = vpop.f32.mrb[24].mxu0 }
 0x61a   : > { %v3485_v36 = vmul.f32 %v5815_v34, %v3406_v13  ;;  %v5459_v48 = vpop.f32.mrb[25].mxu0 }
 0x61b   : > { %v3409_v40 = vpop.f32.mrb[26].mxu0 }
 0x61c   : > { %v3521_v47 = vcombine.low %v3481_v56, %v3485_v36  ;;  %v3522_v27 = vcombine.high %v3481_v56, %v3485_v36  ;;  %v3486_v24 = vmul.f32 %v5819_v58, %v3409_v40  ;;  %v5460_v61 = vpop.f32.mrb[27].mxu0 }
 0x61e   : > { %v3529_v49 = vrot.slane %v3521_v47, %v6501_v10  ;;  %v3536_v9 = vrot.slane %v3522_v27, %v6501_v10  ;;  %v3657_v11 = vcombine.low %v3482_v35, %v3486_v24  ;;  %v3658_v7 = vcombine.high %v3482_v35, %v3486_v24 }
 0x620   : > { %v3585_v28 = vcombine.low %v3529_v49, %v3545_v20  ;;  %v3586_v19 = vcombine.high %v3529_v49, %v3545_v20  ;;  %v3601_v50 = vcombine.low %v3536_v9, %v3552_v38  ;;  %v3602_v39 = vcombine.high %v3536_v9, %v3552_v38 }
 0x621   : > { %v3665_v16 = vrot.slane %v3657_v11, %v6501_v10  ;;  %v3672_v54 = vrot.slane %v3658_v7, %v6501_v10 }
 0x622   : > { %v3593_v46 = vrot.slane %v3585_v28, %v6506_v17  ;;  %v3600_v15 = vrot.slane %v3586_v19, %v6506_v17  ;;  %v3609_v57 = vrot.slane %v3601_v50, %v6506_v17  ;;  %v3616_v1 = vrot.slane %v3602_v39, %v6506_v17 }
 0x623   : > { %v3721_v8 = vcombine.low %v3665_v16, %v3681_v31  ;;  %v3722_v55 = vcombine.high %v3665_v16, %v3681_v31  ;;  %v3737_v52 = vcombine.low %v3672_v54, %v3688_v3  ;;  %v3738_v32 = vcombine.high %v3672_v54, %v3688_v3 }
 0x624   : > { %v5159_v62 = vcombine.low %v3593_v46, %v3600_v15  ;;  %v5161_v26 = vcombine.high %v3593_v46, %v3600_v15  ;;  %v5163_v5 = vcombine.low %v3609_v57, %v3616_v1  ;;  %v5165_v0 = vcombine.high %v3609_v57, %v3616_v1 }
 0x625   : > { %v3729_v51 = vrot.slane %v3721_v8, %v6506_v17  ;;  %v3736_v42 = vrot.slane %v3722_v55, %v6506_v17  ;;  %v3745_v45 = vrot.slane %v3737_v52, %v6506_v17  ;;  %v3752_v22 = vrot.slane %v3738_v32, %v6506_v17 }
 0x626   : > { %v3776_v12 = vrot.slane %v5159_v62, %v6501_v10  ;;  %v3792_v44 = vrot.slane %v5161_v26, %v6501_v10  ;;  %v3808_v43 = vrot.slane %v5163_v5, %v6501_v10  ;;  %v3824_v25 = vrot.slane %v5165_v0, %v6501_v10 }
 0x627   : > { %v5167_v2 = vcombine.low %v3729_v51, %v3736_v42  ;;  %v5169_v60 = vcombine.high %v3729_v51, %v3736_v42  ;;  %v5171_v33 = vcombine.low %v3745_v45, %v3752_v22  ;;  %v5173_v18 = vcombine.high %v3745_v45, %v3752_v22 }
 0x628   : > { %v3841_v41 = vcombine.low %v3776_v12, %v3792_v44  ;;  %v3873_v63 = vcombine.low %v3808_v43, %v3824_v25  ;;  %v3842_v34 = vcombine.high %v3776_v12, %v3792_v44  ;;  %v3874_v13 = vcombine.high %v3808_v43, %v3824_v25 }
 0x629   : > { %v3912_v56 = vrot.slane %v5167_v2, %v6501_v10  ;;  %v3928_v36 = vrot.slane %v5169_v60, %v6501_v10  ;;  %v3944_v48 = vrot.slane %v5171_v33, %v6501_v10  ;;  %v3960_v58 = vrot.slane %v5173_v18, %v6501_v10  ;;  %v5671_v10 = vld [vmem:[#allocation7 + $0x38] sm:$0xff]  }
 0x62a   : > { %v3849_v40 = vrot.slane %v3841_v41, %v6506_v17  ;;  %v3881_v35 = vrot.slane %v3873_v63, %v6506_v17  ;;  %v3856_v47 = vrot.slane %v3842_v34, %v6506_v17  ;;  %v3888_v27 = vrot.slane %v3874_v13, %v6506_v17  ;;  %5482 = vmatpush3.bf16.msra.mxu0 %v5671_v10  ;;  %v5677_v10 = vld [vmem:[#allocation8 + $0xc] ss:$16 sps:$4 sm:$0xff]  }
 0x62b   : > { %v3977_v24 = vcombine.low %v3912_v56, %v3928_v36  ;;  %v4009_v61 = vcombine.low %v3944_v48, %v3960_v58  ;;  %v3978_v20 = vcombine.high %v3912_v56, %v3928_v36  ;;  %v4010_v38 = vcombine.high %v3944_v48, %v3960_v58  ;;  %v5174_v58 = vld [vmem:[%s7457_s5] ss:$0 sm:$0xff]  ;;  %4522 = vmatprep.subr.bf16.mxu0 %v5677_v10  ;;  %v5727_v10 = vld [vmem:[#allocation10 + $0x88] sm:$0xff]  }
 0x62c   : > { %v3894_v49 = vcombine.high %v3849_v40, %v3881_v35  ;;  %v3893_v9 = vcombine.low %v3849_v40, %v3881_v35  ;;  %v3896_v11 = vcombine.high %v3856_v47, %v3888_v27  ;;  %v3895_v7 = vcombine.low %v3856_v47, %v3888_v27 }
 0x62d   : > { %v3985_v28 = vrot.slane %v3977_v24, %v6506_v17  ;;  %v4017_v19 = vrot.slane %v4009_v61, %v6506_v17  ;;  %v3992_v50 = vrot.slane %v3978_v20, %v6506_v17  ;;  %v4024_v39 = vrot.slane %v4010_v38, %v6506_v17  ;;  %v5824_v24 = vld [vmem:[%s6352_s26] sm:$0xff] }
 0x62f   : > { %v4030_v31 = vcombine.high %v3985_v28, %v4017_v19  ;;  %v4029_v3 = vcombine.low %v3985_v28, %v4017_v19  ;;  %v4032_v16 = vcombine.high %v3992_v50, %v4024_v39  ;;  %v4031_v54 = vcombine.low %v3992_v50, %v4024_v39  ;;  %v5680_v28 = vld [vmem:[#allocation8 + $0x24] ss:$16 sps:$4 sm:$0xff]   ;;  %v5683_v19 = vld [vmem:[#allocation8 + $0x2c] ss:$16 sps:$4 sm:$0xff]   ;;  %v5678_v50 = vld [vmem:[#allocation8 + $0x20] ss:$16 sps:$4 sm:$0xff]  }
 0x630   : > { %v5681_v39 = vld [vmem:[#allocation8 + $0x28] ss:$16 sps:$4 sm:$0xff]  }
 0x631   : > { %v5617_v46 = vpack.i.bf16 %v4030_v31, %v3894_v49  ;;  %v5612_v4 = vpack.i.bf16 %v4029_v3, %v3893_v9  ;;  %v5627_v15 = vpack.i.bf16 %v4032_v16, %v3896_v11  ;;  %v5622_v57 = vpack.i.bf16 %v4031_v54, %v3895_v7  ;;  %v5825_v49 = vld [vmem:[%s6352_s26 + $0x8] sm:$0xff]  ;;  %v5674_v11 = vld [vmem:[#allocation8 + $0x4] ss:$16 sps:$4 sm:$0xff]  }
 0x632   : > { %v5675_v7 = vld [vmem:[#allocation8 + $0x8] ss:$16 sps:$4 sm:$0xff]   ;;  %4479 = vmatprep.subr.bf16.mxu1 %v5674_v11 }
 0x633   : > { %5618 = vrot.lane.b32.xlu0 %v5617_v46, %s6062_s18  ;;  %5613 = vrot.lane.b32.xlu1 %v5612_v4, %s6063_s13  ;;  %v5725_v11 = vld [vmem:[#allocation10 + $0xc8] sm:$0xff]   ;;  %s7498_s18 = sld [smem:[#allocation19_spill]] }
 0x637   : > { %5628 = vrot.lane.b32.xlu0 %v5627_v15, %s6060_s28  ;;  %5623 = vrot.lane.b32.xlu1 %v5622_v57, %s6061_s3  ;;  %s5968_s28 = scalar_lea.vmem %s7402_s9, 256  ;;  %s5972_s3 = sshll.u32 %s6070_s25, 4  ;;  %s5973_s3 = int_to_ptr.vmem [resolvable:$false] %s5972_s3 }
 0x638   : > { %p5969_p3 = scmp.ne.s32.totalorder %s7402_s9, %s5968_s28  ;;  %p5975_p12 = scmp.lt.s32.totalorder %s7402_s9, %s5973_s3 }
 0x63a   : > { %p5970_p5 = pnand %p5969_p3, %p6294_p10 }
 0x63c   : > { %p5971_p7 = pneg %p5970_p5 }
 0x67b   : > { %v5604_v1 = vpop.permute.xlu1 %5603 }
 0x67c   : > { %v5606_v32 = vunpack.i.h.bf16 %v5604_v1  ;;  %v5605_v62 = vunpack.i.l.bf16 %v5604_v1  ;;  %v5684_v1 = vld [vmem:[#allocation8 + $0x40] ss:$16 sps:$4 sm:$0xff]  }
 0x67e   : > { %v5599_v8 = vpop.permute.xlu0 %5598 }
 0x67f   : > { %v5601_v17 = vunpack.i.h.bf16 %v5599_v8  ;;  %v5600_v55 = vunpack.i.l.bf16 %v5599_v8  ;;  %v5609_v52 = vpop.permute.xlu1 %5608  ;;  %v5686_v8 = vld [vmem:[#allocation8 + $0x44] ss:$16 sps:$4 sm:$0xff]  }
 0x680   : > { %v5611_v0 = vunpack.i.h.bf16 %v5609_v52  ;;  %v5610_v51 = vunpack.i.l.bf16 %v5609_v52  ;;  %v5690_v52 = vld [vmem:[#allocation8 + $0x60] ss:$16 sps:$4 sm:$0xff]  }
 0x681   : > { %v4089_v26 = vsel %vm2576_vm1, %v3889_v59, %v5600_v55  ;;  %v4090_v5 = vsel %vm2576_vm1, %v4025_v21, %v5601_v17  ;;  %v5687_v17 = vld [vmem:[#allocation8 + $0x48] ss:$16 sps:$4 sm:$0xff]   ;;  %v5689_v55 = vld [vmem:[#allocation8 + $0x4c] ss:$16 sps:$4 sm:$0xff]  }
 0x682   : > { %v4093_v22 = vsel %vm4091_vm4, %v4090_v5, %v5606_v32  ;;  %v4092_v12 = vsel %vm4091_vm4, %v4089_v26, %v5605_v62  ;;  %v5692_v32 = vld [vmem:[#allocation8 + $0x64] ss:$16 sps:$4 sm:$0xff]   ;;  %v5693_v62 = vld [vmem:[#allocation8 + $0x68] ss:$16 sps:$4 sm:$0xff]   ;;  %v5695_v26 = vld [vmem:[#allocation8 + $0x6c] ss:$16 sps:$4 sm:$0xff]  }
 0x683   : > { %v4095_v25 = vsel %vm4094_vm5, %v4092_v12, %v5610_v51  ;;  %v4096_v2 = vsel %vm4094_vm5, %v4093_v22, %v5611_v0  ;;  %v5698_v5 = vld [vmem:[#allocation8 + $0x84] ss:$16 sps:$4 sm:$0xff]   ;;  %v5701_v0 = vld [vmem:[#allocation8 + $0x8c] ss:$16 sps:$4 sm:$0xff]   ;;  %v5696_v51 = vld [vmem:[#allocation8 + $0x80] ss:$16 sps:$4 sm:$0xff]  }
 0x684   : > { %v5707_v22 = vld [vmem:[#allocation8 + $0xac] ss:$16 sps:$4 sm:$0xff]   ;;  %v5702_v12 = vld [vmem:[#allocation8 + $0xa0] ss:$16 sps:$4 sm:$0xff]  }
 0x6a5   : > { %v5619_v42 = vpop.permute.xlu0 %5618  ;;  %v5614_v45 = vpop.permute.xlu1 %5613 }
 0x6a6   : > { %v5616_v44 = vunpack.i.h.bf16 %v5614_v45  ;;  %v5615_v43 = vunpack.i.l.bf16 %v5614_v45  ;;  %v5621_v37 = vunpack.i.h.bf16 %v5619_v42  ;;  %v5620_v23 = vunpack.i.l.bf16 %v5619_v42  ;;  %v5699_v42 = vld [vmem:[#allocation8 + $0x88] ss:$16 sps:$4 sm:$0xff]   ;;  %v5704_v45 = vld [vmem:[#allocation8 + $0xa4] ss:$16 sps:$4 sm:$0xff]  }
 0x6a8   : > { %v4098_v59 = vsel %vm4097_vm6, %v4095_v25, %v5615_v43  ;;  %v4099_v60 = vsel %vm4097_vm6, %v4096_v2, %v5616_v44  ;;  %v5705_v44 = vld [vmem:[#allocation8 + $0xa8] ss:$16 sps:$4 sm:$0xff]   ;;  %v5710_v43 = vld [vmem:[#allocation8 + $0xc4] ss:$16 sps:$4 sm:$0xff]   ;;  %v5713_v25 = vld [vmem:[#allocation8 + $0xcc] ss:$16 sps:$4 sm:$0xff]  }
 0x6a9   : > { %v5629_v29 = vpop.permute.xlu0 %5628  ;;  %v5624_v30 = vpop.permute.xlu1 %5623  ;;  %v4101_v63 = vsel %vm4100_vm7, %v4098_v59, %v5620_v23  ;;  %v4102_v34 = vsel %vm4100_vm7, %v4099_v60, %v5621_v37  ;;  %v5708_v2 = vld [vmem:[#allocation8 + $0xc0] ss:$16 sps:$4 sm:$0xff]   ;;  %v5711_v37 = vld [vmem:[#allocation8 + $0xc8] ss:$16 sps:$4 sm:$0xff]   ;;  %v5716_v23 = vld [vmem:[#allocation8 + $0xe4] ss:$16 sps:$4 sm:$0xff]  }
 0x6aa   : > { %v5631_v21 = vunpack.i.h.bf16 %v5629_v29  ;;  %v5630_v33 = vunpack.i.l.bf16 %v5629_v29  ;;  %v5626_v18 = vunpack.i.h.bf16 %v5624_v30  ;;  %v5625_v41 = vunpack.i.l.bf16 %v5624_v30  ;;  %v5719_v59 = vld [vmem:[#allocation8 + $0xec] ss:$16 sps:$4 sm:$0xff]   ;;  %v5714_v60 = vld [vmem:[#allocation8 + $0xe0] ss:$16 sps:$4 sm:$0xff]   ;;  %v5717_v29 = vld [vmem:[#allocation8 + $0xe8] ss:$16 sps:$4 sm:$0xff]  }
 0x6ab   : > { %v5720_v30 = vld [vmem:[#allocation10 + $0x40] sm:$0xff]  }
 0x6ac   : > { %v4104_v13 = vsel %vm4103_vm8, %v4101_v63, %v5625_v41  ;;  %v4105_v53 = vsel %vm4103_vm8, %v4102_v34, %v5626_v18 }
 0x6ad   : > { %v4107_v56 = vsel %vm4106_vm9, %v4104_v13, %v5630_v33  ;;  %v4108_v36 = vsel %vm4106_vm9, %v4105_v53, %v5631_v21  ;;  %v5721_v21 = vld [vmem:[#allocation10 + $0xc0] sm:$0xff]  }
 0x6ae   : > { %v4109_v48 = vpack.c.bf16 %v4108_v36, %v4107_v56  ;;  %v5183_v36 = vld [vmem:[%s7458_s6] ss:$0 sm:$0xff] }
 0x6b0   : > { %5484 = vmatmul.mubr.bf16.vlgmr.msra.gmra.mrb[28].mxu0 %v4109_v48 }
 0x6b1   : > { %4554 = vmatprep.mubr.bf16.mxu0 %v7497_v14  ;;  %v5672_v14 = vld [vmem:[#allocation8] ss:$16 sps:$4 sm:$0xff]   ;;  %4523 = vmatpush1.bf16.msra.mxu0 %v5675_v7  ;;  %v5726_v7 = vld [vmem:[#allocation10 + $0x8] sm:$0xff]  }
 0x6b2   : > { %4480 = vmatpush1.bf16.msra.mxu1 %v5672_v14  ;;  %4524 = vmatprep.subr.bf16.mxu0 %v5683_v19  ;;  %v5724_v14 = vld [vmem:[#allocation10 + $0x48] sm:$0xff]   ;;  %v5729_v19 = vld [vmem:[#allocation10 + $0xd0] sm:$0xff]  }
 0x6b3   : > { %4481 = vmatprep.subr.bf16.mxu1 %v5680_v28  ;;  %v5728_v28 = vld [vmem:[#allocation10 + $0x50] sm:$0xff]  }
 0x6b5   : > { %4525 = vmatpush1.bf16.msra.mxu0 %v5681_v39  ;;  %v5731_v39 = vld [vmem:[#allocation10 + $0x90] sm:$0xff]  }
 0x6b6   : > { %4482 = vmatpush1.bf16.msra.mxu1 %v5678_v50  ;;  %4526 = vmatprep.subr.bf16.mxu0 %v5689_v55  ;;  %v5730_v50 = vld [vmem:[#allocation10 + $0x10] sm:$0xff]   ;;  %v5743_v55 = vld [vmem:[#allocation10 + $0xa8] sm:$0xff]  }
 0x6b7   : > { %4483 = vmatprep.subr.bf16.mxu1 %v5686_v8  ;;  %v5741_v8 = vld [vmem:[#allocation10 + $0xe8] sm:$0xff]  }
 0x6b9   : > { %4527 = vmatpush1.bf16.msra.mxu0 %v5687_v17  ;;  %v5742_v17 = vld [vmem:[#allocation10 + $0x28] sm:$0xff]  }
 0x6ba   : > { %4484 = vmatpush1.bf16.msra.mxu1 %v5684_v1  ;;  %4528 = vmatprep.subr.bf16.mxu0 %v5695_v26  ;;  %v5740_v1 = vld [vmem:[#allocation10 + $0x68] sm:$0xff]   ;;  %v5747_v26 = vld [vmem:[#allocation10 + $0xb0] sm:$0xff]  }
 0x6bb   : > { %4485 = vmatprep.subr.bf16.mxu1 %v5692_v32  ;;  %v5745_v32 = vld [vmem:[#allocation10 + $0xf0] sm:$0xff]  }
 0x6bd   : > { %4529 = vmatpush1.bf16.msra.mxu0 %v5693_v62  ;;  %v5746_v62 = vld [vmem:[#allocation10 + $0x30] sm:$0xff]  }
 0x6be   : > { %4486 = vmatpush1.bf16.msra.mxu1 %v5690_v52  ;;  %4530 = vmatprep.subr.bf16.mxu0 %v5701_v0  ;;  %v5744_v52 = vld [vmem:[#allocation10 + $0x70] sm:$0xff]   ;;  %v5749_v0 = vld [vmem:[#allocation10 + $0xf8] sm:$0xff]  }
 0x6bf   : > { %4487 = vmatprep.subr.bf16.mxu1 %v5698_v5  ;;  %v5748_v5 = vld [vmem:[#allocation10 + $0x78] sm:$0xff]  }
 0x6c1   : > { %4531 = vmatpush1.bf16.msra.mxu0 %v5699_v42  ;;  %v5751_v42 = vld [vmem:[#allocation10 + $0xb8] sm:$0xff]  }
 0x6c2   : > { %4488 = vmatpush1.bf16.msra.mxu1 %v5696_v51  ;;  %4532 = vmatprep.subr.bf16.mxu0 %v5707_v22  ;;  %v5750_v51 = vld [vmem:[#allocation10 + $0x38] sm:$0xff]   ;;  %v4309_v22 = vsub.s32 2, %v6496_v6 }
 0x6c3   : > { %4489 = vmatprep.subr.bf16.mxu1 %v5704_v45  ;;  %v4301_v45 = vsub.s32 0, %v6496_v6 }
 0x6c5   : > { %4533 = vmatpush1.bf16.msra.mxu0 %v5705_v44  ;;  %v4305_v44 = vsub.s32 1, %v6496_v6 }
 0x6c6   : > { %4490 = vmatpush1.bf16.msra.mxu1 %v5702_v12  ;;  %4534 = vmatprep.subr.bf16.mxu0 %v5713_v25  ;;  %v4297_v12 = vld [vmem:[%s7498_s18] sm:$0xf]  ;;  %s5974_s18 = scalar_lea.vmem %s5973_s3, 512 }
 0x6c7   : > { %4491 = vmatprep.subr.bf16.mxu1 %v5710_v43  ;;  %v4313_v43 = vsub.s32 3, %v6496_v6  ;;  %v4302_v25 = vrot.slane %v4297_v12, %v4301_v45  ;;  %p5976_p2 = scmp.lt.s32.totalorder %s5974_s18, %s5968_s28 }
 0x6c9   : > { %4535 = vmatpush1.bf16.msra.mxu0 %v5711_v37  ;;  %v4306_v37 = vrot.slane %v4297_v12, %v4305_v44  ;;  %p5977_p1 = por %p5976_p2, %p5975_p12 }
 0x6ca   : > { %4492 = vmatpush1.bf16.msra.mxu1 %v5708_v2  ;;  %4536 = vmatprep.subr.bf16.mxu0 %v5719_v59  ;;  %v4310_v2 = vrot.slane %v4297_v12, %v4309_v22 }
 0x6cb   : > { %4493 = vmatprep.subr.bf16.mxu1 %v5716_v23  ;;  %v4314_v23 = vrot.slane %v4297_v12, %v4313_v43  ;;  %p5978_p13 = pnand %p5977_p1, %p5971_p7 }
 0x6cd   : > { %4537 = vmatpush1.bf16.msra.mxu0 %v5717_v29 }
 0x6ce   : > { %4494 = vmatpush1.bf16.msra.mxu1 %v5714_v60  ;;  %5329 = vmatprep.subr.bf16.mxu0 %v5721_v21 }
 0x6cf   : > { %5307 = vmatprep.subr.bf16.mxu1 %v5720_v30 }
 0x783   : > { %v4215_v40 = vpop.f32.mrb[28].mxu0 }
 0x784   : > { %v4216_v35 = vadd.f32 %v5174_v58, %v4215_v40  ;;  %v5485_v47 = vpop.f32.mrb[29].mxu0 }
 0x785   : > { %v4218_v27 = vpop.f32.mrb[30].mxu0 }
 0x786   : > { %v7363_v61 = vadd.f32 %v5824_v24, %v4216_v35  ;;  %v4219_v20 = vadd.f32 %v5174_v58, %v4218_v27  ;;  %v5486_v38 = vpop.f32.mrb[31].mxu0  ;;  %v5184_v35 = vld [vmem:[%s7459_s7] ss:$0 sm:$0xff] }
 0x787   : > { %v5723_v38 = vld [vmem:[#allocation10 + $0x80] sm:$0xff]  }
 0x788   : > { %v7366_v9 = vadd.f32 %v5825_v49, %v4219_v20  ;;  %4226 = vadd.xlane.f32.xlu1 %v7363_v61  ;;  %v5722_v20 = vld [vmem:[#allocation10] sm:$0xff]  }
 0x78a   : > { %4228 = vadd.xlane.f32.xlu0 %v7366_v9 }
 0x815   : > { %v4227_v31 = vpop.xlane.xlu1 %4226 }
 0x816   : > { %v4230_v3 = vmul.f32 0.0078125, %v4227_v31  ;;  %v5732_v31 = vld [vmem:[#allocation10 + $0x58] sm:$0xff]  }
 0x817   : > { %v4229_v16 = vpop.xlane.xlu0 %4228 }
 0x818   : > { %v7371_v54 = vsub.f32 %v7363_v61, %v4230_v3  ;;  %v4231_v46 = vmul.f32 0.0078125, %v4229_v16  ;;  %v5733_v3 = vld [vmem:[#allocation10 + $0xd8] sm:$0xff]  }
 0x819   : > { %v5734_v16 = vld [vmem:[#allocation10 + $0x18] sm:$0xff]  }
 0x81a   : > { %v7374_v4 = vsub.f32 %v7366_v9, %v4231_v46  ;;  %v4234_v15 = vmul.f32 %v7371_v54, %v7371_v54  ;;  %v5736_v46 = vld [vmem:[#allocation10 + $0x60] sm:$0xff]  }
 0x81c   : > { %4236 = vadd.xlane.f32.xlu0 %v4234_v15  ;;  %v4235_v57 = vmul.f32 %v7374_v4, %v7374_v4  ;;  %v5738_v15 = vld [vmem:[#allocation10 + $0x20] sm:$0xff]  }
 0x820   : > { %4238 = vadd.xlane.f32.xlu0 %v4235_v57  ;;  %v5739_v57 = vld [vmem:[#allocation10 + $0xa0] sm:$0xff]  }
 0x8a9   : > { %v4237_v33 = vpop.xlane.xlu0 %4236 }
 0x8aa   : > { %v4240_v18 = vmul.f32 0.0078125, %v4237_v33 }
 0x8ac   : > { %v4242_v41 = vadd.f32 1e-05, %v4240_v18 }
 0x8ad   : > { %v4239_v63 = vpop.xlane.xlu0 %4238 }
 0x8ae   : > { %5820 = vrsqrt.f32 %v4242_v41  ;;  %v4241_v34 = vmul.f32 0.0078125, %v4239_v63 }
 0x8b0   : > { %v4243_v13 = vadd.f32 1e-05, %v4241_v34 }
 0x8b2   : > { %5822 = vrsqrt.f32 %v4243_v13 }
 0x8b8   : > { %v5821_v53 = vpop.eup %5820 }
 0x8b9   : > { %v4246_v56 = vmul.f32 %v5821_v53, %v7371_v54  ;;  %v5735_v54 = vld [vmem:[#allocation10 + $0x98] sm:$0xff]  }
 0x8bb   : > { %v4254_v40 = vmul.f32 %v5183_v36, %v4246_v56 }
 0x8bc   : > { %v5823_v48 = vpop.eup %5822 }
 0x8bd   : > { %v4247_v58 = vmul.f32 %v5823_v48, %v7374_v4  ;;  %v4262_v27 = vadd.f32 %v5184_v35, %v4254_v40  ;;  %v5737_v4 = vld [vmem:[#allocation10 + $0xe0] sm:$0xff]  }
 0x8bf   : > { %v4255_v47 = vmul.f32 %v5183_v36, %v4247_v58 }
 0x8c1   : > { %v4263_v24 = vadd.f32 %v5184_v35, %v4255_v47 }
 0x8c3   : > { %v4264_v49 = vpack.c.bf16 %v4263_v24, %v4262_v27 }
 0x8c5   : > { %4512 = vmatmul.mubr.bf16.vlgmr.msra.gmra.mrb[44].mxu1 %v4264_v49  ;;  %4555 = vmatmul.mubr.bf16.vlgmr.msra.gmra.mrb[32].mxu0 %v4264_v49 }
 0x8c6   : > { %5308 = vmatpush3.bf16.msra.mxu1 %v5722_v20  ;;  %5330 = vmatpush3.bf16.msra.mxu0 %v5723_v38 }
 0x8c7   : > { %5309 = vmatprep.subr.bf16.mxu1 %v5724_v14  ;;  %5331 = vmatprep.subr.bf16.mxu0 %v5725_v11 }
 0x8ca   : > { %5310 = vmatpush3.bf16.msra.mxu1 %v5726_v7  ;;  %5332 = vmatpush3.bf16.msra.mxu0 %v5727_v10 }
 0x8cb   : > { %5311 = vmatprep.subr.bf16.mxu1 %v5728_v28  ;;  %5333 = vmatprep.subr.bf16.mxu0 %v5729_v19  ;;  %v5217_v19 = vld [vmem:[%s7499_s12] ss:$0 sm:$0xff] }
 0x8ce   : > { %5312 = vmatpush3.bf16.msra.mxu1 %v5730_v50  ;;  %5334 = vmatpush3.bf16.msra.mxu0 %v5731_v39 }
 0x8cf   : > { %5313 = vmatprep.subr.bf16.mxu1 %v5732_v31  ;;  %5335 = vmatprep.subr.bf16.mxu0 %v5733_v3 }
 0x8d2   : > { %5314 = vmatpush3.bf16.msra.mxu1 %v5734_v16  ;;  %5336 = vmatpush3.bf16.msra.mxu0 %v5735_v54 }
 0x8d3   : > { %5315 = vmatprep.subr.bf16.mxu1 %v5736_v46  ;;  %5337 = vmatprep.subr.bf16.mxu0 %v5737_v4 }
 0x8d6   : > { %5316 = vmatpush3.bf16.msra.mxu1 %v5738_v15  ;;  %5338 = vmatpush3.bf16.msra.mxu0 %v5739_v57 }
 0x8d7   : > { %5317 = vmatprep.subr.bf16.mxu1 %v5740_v1  ;;  %5339 = vmatprep.subr.bf16.mxu0 %v5741_v8 }
 0x8da   : > { %5318 = vmatpush3.bf16.msra.mxu1 %v5742_v17  ;;  %5340 = vmatpush3.bf16.msra.mxu0 %v5743_v55 }
 0x8db   : > { %5319 = vmatprep.subr.bf16.mxu1 %v5744_v52  ;;  %5341 = vmatprep.subr.bf16.mxu0 %v5745_v32 }
 0x8de   : > { %5320 = vmatpush3.bf16.msra.mxu1 %v5746_v62  ;;  %5342 = vmatpush3.bf16.msra.mxu0 %v5747_v26 }
 0x8df   : > { %5321 = vmatprep.subr.bf16.mxu1 %v5748_v5  ;;  %5343 = vmatprep.subr.bf16.mxu0 %v5749_v0 }
 0x8e2   : > { %5322 = vmatpush3.bf16.msra.mxu1 %v5750_v51  ;;  %5344 = vmatpush3.bf16.msra.mxu0 %v5751_v42 }
 0x998   : > { %v4513_v59 = vpop.f32.mrb[44].mxu1  ;;  %v4556_v60 = vpop.f32.mrb[32].mxu0 }
 0x999   : > { %v4514_v29 = vadd.f32 %v4513_v59, %v4302_v25  ;;  %v4557_v30 = vadd.f32 %v4556_v60, %v4310_v2  ;;  %v4515_v21 = vpop.f32.mrb[45].mxu1  ;;  %v4558_v33 = vpop.f32.mrb[33].mxu0 }
 0x99a   : > { %v4516_v18 = vadd.f32 %v4515_v21, %v4306_v37  ;;  %v4559_v41 = vadd.f32 %v4558_v33, %v4314_v23  ;;  %v4517_v63 = vpop.f32.mrb[46].mxu1  ;;  %v4560_v34 = vpop.f32.mrb[34].mxu0 }
 0x99b   : > { %v4518_v13 = vadd.f32 %v4517_v63, %v4302_v25  ;;  %v4561_v53 = vadd.f32 %v4560_v34, %v4310_v2  ;;  %v4519_v56 = vpop.f32.mrb[47].mxu1  ;;  %v4562_v36 = vpop.f32.mrb[35].mxu0  ;;  %v4565_v58 = vmax.f32 %v4514_v29, 0.0  ;;  %v4567_v40 = vmax.f32 %v4557_v30, 0.0 }
 0x99c   : > { %v4520_v48 = vadd.f32 %v4519_v56, %v4306_v37  ;;  %v4563_v6 = vadd.f32 %v4562_v36, %v4314_v23  ;;  %v4566_v27 = vmax.f32 %v4516_v18, 0.0  ;;  %v4568_v24 = vmax.f32 %v4559_v41, 0.0 }
 0x99d   : > { %v4569_v35 = vmax.f32 %v4518_v13, 0.0  ;;  %v4571_v47 = vmax.f32 %v4561_v53, 0.0 }
 0x99e   : > { %v4570_v20 = vmax.f32 %v4520_v48, 0.0  ;;  %v4572_v38 = vmax.f32 %v4563_v6, 0.0 }
 0x99f   : > { %v4573_v49 = vpack.c.bf16 %v4569_v35, %v4565_v58  ;;  %v4575_v14 = vpack.c.bf16 %v4571_v47, %v4567_v40 }
 0x9a0   : > { %v4574_v11 = vpack.c.bf16 %v4570_v20, %v4566_v27  ;;  %v4576_v7 = vpack.c.bf16 %v4572_v38, %v4568_v24 }
 0x9a2   : > { %4872 = vmatprep.mubr.bf16.mxu1 %v4574_v11  ;;  %4913 = vmatprep.mubr.bf16.mxu0 %v4576_v7 }
 0x9a3   : > { %4873 = vmatmul.mubr.bf16.vlgmr.msra.gmra.mrb[48].mxu1 %v4573_v49  ;;  %4914 = vmatmul.mubr.bf16.vlgmr.msra.gmra.mrb[36].mxu0 %v4575_v14 }
 0xa76   : > { %v5323_v10 = vpop.f32.mrb[48].mxu1  ;;  %v5345_v28 = vpop.f32.mrb[36].mxu0 }
 0xa77   : > { %v5324_v50 = vpop.f32.mrb[49].mxu1  ;;  %v5346_v39 = vpop.f32.mrb[37].mxu0 }
 0xa78   : > { %v5325_v31 = vadd.f32 %v5324_v50, %v5323_v10  ;;  %v5347_v3 = vadd.f32 %v5346_v39, %v5345_v28  ;;  %v5326_v16 = vpop.f32.mrb[50].mxu1  ;;  %v5348_v54 = vpop.f32.mrb[38].mxu0 }
 0xa79   : > { %v5327_v46 = vpop.f32.mrb[51].mxu1  ;;  %v5349_v4 = vpop.f32.mrb[39].mxu0 }
 0xa7a   : > { %v4875_v15 = vadd.f32 %v5325_v31, %v5217_v19  ;;  %v5328_v57 = vadd.f32 %v5327_v46, %v5326_v16  ;;  %v5350_v1 = vadd.f32 %v5349_v4, %v5348_v54 }
 0xa7c   : > { %v4916_v8 = vadd.f32 %v5347_v3, %v4875_v15  ;;  %v4878_v17 = vadd.f32 %v5328_v57, %v5217_v19 }
 0xa7e   : > { %v4922_v55 = vadd.f32 %v4916_v8, %v7363_v61  ;;  %v4919_v52 = vadd.f32 %v5350_v1, %v4878_v17 }
 0xa80   : > { %4924 = vst [vmem:[%s489_s14] sm:$0xff] %v4922_v55  ;;  %v4923_v32 = vadd.f32 %v4919_v52, %v7366_v9 }
 0xa82   : > { %4925 = vst [vmem:[%s489_s14 + $0x8] sm:$0xff] %v4923_v32 }
 0xa83   : > { %5981 = shalt.err (!%p5978_p13)
}
 0xa84   : > { %s5982_s13 = scalar_lea.hbm %s7407_s16, 256  ;;  %s5986_s14 = scalar_lea.hbm %s7500_s17, 512 }
 0xa85   : > { %p5983_p9 = scmp.ne.s32.totalorder %s7407_s16, %s5982_s13  ;;  %p5987_p4 = scmp.lt.u32.totalorder %s7407_s16, %s7500_s17 }
 0xa86   : > { %p5988_p8 = scmp.lt.u32.totalorder %s5986_s14, %s5982_s13  ;;  %p5990_p3 = scmp.lt.u32.totalorder %s5982_s13, %s7407_s16 }
 0xa87   : > { %p5984_p0 = pnand %p5983_p9, %p6294_p10 }
 0xa88   : > { %p5989_p6 = por %p5988_p8, %p5987_p4 }
 0xa89   : > { %p5985_p11 = pneg %p5984_p0 }
 0xa8a   : > { %p5991_p5 = por %p5990_p3, %p5989_p6 }
 0xa8c   : > { %p5992_p7 = pnand %p5991_p5, %p5985_p11 }
 0xa8e   : > { %5995 = shalt.err (!%p5992_p7)
}
 0xa8f   : > { %s6071_s29 = smov 128   ;;  %s6072_s28 = smov 8  }
 0xa90   : > { %5505 = dma.vmem_to_hbm [thread:$0]  (%p6294_p10), %s7402_s9, 256, %s7407_s16, %s4927_s11, %s6071_s29, %s6071_s29, %s6072_s28  }
 0xa91 PF: > { %s7501_s25 = sld [smem:[#allocation16_spill]]  ;;  %s7502_s3 = sld [smem:[#allocation17_spill]] }
 0xa92   : > { %p7504_p2 = scmp.ge.s32.totalorder %s6042_s24, 2 }
 0xa97   : > { %s4955_s18 = sand.u32 1, %s7501_s25   ;;  %p7503_p12 = scmp.ne.s32.totalorder %s7502_s3, 0 }
 0xa98   : > { %s4956_s13 = scalar_lea.sflag [#allocation4], %s4955_s18 }
 0xa99   : > { %p5525_p1 = pnand %p7504_p2, %p7503_p12 }
 0xa9b   : > { %6025 = dma.done.wait (!%p5525_p1), %s4956_s13, 256  }
 0xa9c   : > { %6027 = vsyncadd (!%p5525_p1), %s4956_s13, 4294967040  ;;  %p27_p13 = scmp.ge.s32.totalorder %s6284_s30, 4   ;;  %s7505_s21 = smov %s6034_s22 }
 0xa9d   : > { %s7506_s22 = smov %s6038_s23  ;;  %s7507_s23 = smov %s6300_s20 }
 0xa9e   : > { %s7508_s24 = smov %s6284_s30  ;;  %29 = sbr.rel (!%p27_p13) target bundleno = 12 (0xc), region = 129 }
 0xaa5   :  { %4961 = vsyncpa [#allocation3], 1 }
 0xaa6   :  { %4963 = vsyncpa [#allocation3 + $0x1], 1 }
 0xaa7   :  { %4964 = vsyncpa [#allocation6], 1 }
 0xaa8   :  { %4965 = vsyncpa [#allocation9], 1 }
 0xaa9   :  { %4966 = vsyncpa [#allocation4], 1 }
 0xaaa   :  { %4968 = vsyncpa [#allocation4 + $0x1], 1 }

</bundles_post_ra>
